<compile_context>
chip_gen: v6e
topology: v6e:2x2x1
jax: 0.10.0
libtpu: 0.0.40
codegen_flags: <defaults>
</compile_context>

<pallas_src>
import functools
import math

import jax
import jax.numpy as jnp
from jax.experimental import pallas as pl
from jax.experimental.pallas import tpu as pltpu

NEG_INF = -1e9


# ------------------------- fused decoder-layer kernel ------------------------

def _decoder_layer_kernel(
    x_ref, mem_ref, smask_ref, cmask_ref,
    wqkv_s_ref, bqkv_s_ref, wo_s_ref, bo_s_ref,
    wq_c_ref, bq_c_ref, wkv_c_ref, bkv_c_ref, wo_c_ref, bo_c_ref,
    w1_ref, b1_ref, w2_ref, b2_ref,
    lng_ref, lnb_ref,
    o_ref,
    *, num_heads, eps,
):
    x = x_ref[0]        # [T, E]  f32
    mem = mem_ref[0]    # [S, E]  f32
    T, E = x.shape
    H = num_heads
    D = E // H
    scale = 1.0 / math.sqrt(D)

    # MXU helpers: bf16 operands, f32 accumulation.
    def mm(a, b):
        return jnp.dot(a.astype(jnp.bfloat16), b.astype(jnp.bfloat16),
                       preferred_element_type=jnp.float32)

    def mm_nt(a, b):  # a[M,K] x b[N,K]^T -> [M,N] without materializing b.T
        return jax.lax.dot_general(
            a.astype(jnp.bfloat16), b.astype(jnp.bfloat16),
            dimension_numbers=(((1,), (1,)), ((), ())),
            preferred_element_type=jnp.float32)

    def layer_norm(v, idx):  # f32 statistics, per-row over E
        mu = jnp.mean(v, axis=-1, keepdims=True)
        var = jnp.mean((v - mu) ** 2, axis=-1, keepdims=True)
        g = lng_ref[idx:idx + 1, :]   # [1, E]
        b = lnb_ref[idx:idx + 1, :]   # [1, E]
        return (v - mu) * jax.lax.rsqrt(var + eps) * g + b

    def attend_project(q_all, k_all, v_all, mask, wo_ref, bo_ref):
        # q_all [Tq,E], k_all/v_all [Tk,E], mask [Tq,Tk] additive.
        # Per-head attention; output projection folded into the head loop so
        # no concat is needed:  out = sum_h softmax(q_h k_h^T) v_h @ Wo[h].
        acc = jnp.zeros((q_all.shape[0], E), jnp.float32)
        for h in range(H):
            sl = slice(h * D, (h + 1) * D)
            s = mm_nt(q_all[:, sl], k_all[:, sl]) * scale + mask   # [Tq,Tk] f32
            s = s - jnp.max(s, axis=-1, keepdims=True)
            p = jnp.exp(s)
            p = p * pl.reciprocal(jnp.sum(p, axis=-1, keepdims=True),
                                  approx=True)
            oh = mm(p, v_all[:, sl])                               # [Tq,D]
            acc = acc + mm(oh, wo_ref[sl, :])                      # [Tq,E]
        return acc + bo_ref[...]

    # ---------------- self-attention block ----------------
    qkv = mm(x, wqkv_s_ref[...]) + bqkv_s_ref[...]                 # [T,3E]
    q, k, v = qkv[:, :E], qkv[:, E:2 * E], qkv[:, 2 * E:]
    sa = attend_project(q, k, v, smask_ref[0], wo_s_ref, bo_s_ref)
    x = layer_norm(x + sa, 0)

    # ---------------- cross-attention block ----------------
    qc = mm(x, wq_c_ref[...]) + bq_c_ref[...]                      # [T,E]
    kv = mm(mem, wkv_c_ref[...]) + bkv_c_ref[...]                  # [S,2E]
    kc, vc = kv[:, :E], kv[:, E:]
    ca = attend_project(qc, kc, vc, cmask_ref[0], wo_c_ref, bo_c_ref)
    x = layer_norm(x + ca, 1)

    # ---------------- feed-forward block (FF stays on-chip) ----------------
    h1 = jnp.maximum(mm(x, w1_ref[...]) + b1_ref[...], 0.0)        # [T,FF]
    ff = mm(h1, w2_ref[...]) + b2_ref[...]                         # [T,E]
    x = layer_norm(x + ff, 2)

    o_ref[0] = x.astype(o_ref.dtype)


def decoder_layer_forward(p, x, memory, mem_pad_mask, tgt_mask, tgt_pad_mask):
    """One fused decoder layer.  x:[B,T,E], memory:[B,S,E]."""
    B, T, E = x.shape
    S = memory.shape[1]
    H = p["num_heads"]
    FF = p["w1"].shape[1]

    # Additive float masks shared across heads: [B,Tq,Tk].
    self_mask = jnp.broadcast_to(tgt_mask[None, :, :], (B, T, T))
    if tgt_pad_mask is not None:
        self_mask = self_mask + jnp.where(tgt_pad_mask, NEG_INF,
                                          0.0)[:, None, :]
    cross_mask = jnp.broadcast_to(
        jnp.where(mem_pad_mask, NEG_INF, 0.0)[:, None, :], (B, T, S))

    wspec = lambda shape: pl.BlockSpec(shape, lambda b: (0, 0))

    return pl.pallas_call(
        functools.partial(_decoder_layer_kernel, num_heads=H, eps=1e-5),
        out_shape=jax.ShapeDtypeStruct((B, T, E), jnp.float32),
        grid=(B,),
        in_specs=[
            pl.BlockSpec((1, T, E), lambda b: (b, 0, 0)),   # x
            pl.BlockSpec((1, S, E), lambda b: (b, 0, 0)),   # memory
            pl.BlockSpec((1, T, T), lambda b: (b, 0, 0)),   # self mask
            pl.BlockSpec((1, T, S), lambda b: (b, 0, 0)),   # cross mask
            wspec((E, 3 * E)), wspec((1, 3 * E)),           # wqkv_s, bqkv_s
            wspec((E, E)), wspec((1, E)),                   # wo_s, bo_s
            wspec((E, E)), wspec((1, E)),                   # wq_c, bq_c
            wspec((E, 2 * E)), wspec((1, 2 * E)),           # wkv_c, bkv_c
            wspec((E, E)), wspec((1, E)),                   # wo_c, bo_c
            wspec((E, FF)), wspec((1, FF)),                 # w1, b1
            wspec((FF, E)), wspec((1, E)),                  # w2, b2
            wspec((3, E)), wspec((3, E)),                   # ln gamma/beta
        ],
        out_specs=pl.BlockSpec((1, T, E), lambda b: (b, 0, 0)),
        compiler_params=pltpu.CompilerParams(
            dimension_semantics=("parallel",)),
    )(x, memory, self_mask, cross_mask,
      p["wqkv_s"], p["bqkv_s"], p["wo_s"], p["bo_s"],
      p["wq_c"], p["bq_c"], p["wkv_c"], p["bkv_c"], p["wo_c"], p["bo_c"],
      p["w1"], p["b1"], p["w2"], p["b2"],
      p["ln_g"], p["ln_b"])


# ----------------------------- final LayerNorm ------------------------------

def _ln_kernel(x_ref, g_ref, b_ref, o_ref, *, eps):
    x = x_ref[...]
    mu = jnp.mean(x, axis=-1, keepdims=True)
    var = jnp.mean((x - mu) ** 2, axis=-1, keepdims=True)
    o_ref[...] = (x - mu) * jax.lax.rsqrt(var + eps) * g_ref[...] + b_ref[...]


def final_layer_norm(x, gamma, beta, eps=1e-5):
    B, T, E = x.shape
    M = B * T
    out = pl.pallas_call(
        functools.partial(_ln_kernel, eps=eps),
        out_shape=jax.ShapeDtypeStruct((M, E), jnp.float32),
        grid=(1,),
        in_specs=[
            pl.BlockSpec((M, E), lambda i: (0, 0)),
            pl.BlockSpec((1, E), lambda i: (0, 0)),
            pl.BlockSpec((1, E), lambda i: (0, 0)),
        ],
        out_specs=pl.BlockSpec((M, E), lambda i: (0, 0)),
    )(x.reshape(M, E), gamma.reshape(1, E), beta.reshape(1, E))
    return out.reshape(B, T, E)


# ------------------------------ forward (spec) ------------------------------

def manual_decoder_forward(params, x, encoded, memory, memory_masks,
                           src_padding_mask, tgt_mask, tgt_padding_mask,
                           training):
    """Mirrors ManualDecoder.forward exactly."""
    output = x
    if not training:
        for mem, mask in zip(memory, memory_masks):
            output = decoder_layer_forward(params["layers"][0], output, mem,
                                           mask, tgt_mask, tgt_padding_mask)
    for layer_p in params["layers"]:
        output = decoder_layer_forward(layer_p, output, encoded,
                                       src_padding_mask, tgt_mask,
                                       tgt_padding_mask)
    return final_layer_norm(output, params["norm_g"], params["norm_b"])


# ------------------------------ parameter init ------------------------------

def _init_layer(key, E, H, FF):
    ks = jax.random.split(key, 7)
    w = lambda k, s: jax.random.normal(k, s, jnp.float32) * 0.05
    return {
        "num_heads": H,
        # self-attention: fused QKV weights [E, 3E]
        "wqkv_s": w(ks[0], (E, 3 * E)),
        "bqkv_s": jnp.zeros((1, 3 * E), jnp.float32),
        "wo_s": w(ks[1], (E, E)), "bo_s": jnp.zeros((1, E), jnp.float32),
        # cross-attention: Q weight + fused KV weights [E, 2E]
        "wq_c": w(ks[2], (E, E)), "bq_c": jnp.zeros((1, E), jnp.float32),
        "wkv_c": w(ks[3], (E, 2 * E)),
        "bkv_c": jnp.zeros((1, 2 * E), jnp.float32),
        "wo_c": w(ks[4], (E, E)), "bo_c": jnp.zeros((1, E), jnp.float32),
        # feed-forward
        "w1": w(ks[5], (E, FF)), "b1": jnp.zeros((1, FF), jnp.float32),
        "w2": w(ks[6], (FF, E)), "b2": jnp.zeros((1, E), jnp.float32),
        # three LayerNorms packed: rows 0/1/2 = post-self / post-cross / post-FFN
        "ln_g": jnp.ones((3, E), jnp.float32),
        "ln_b": jnp.zeros((3, E), jnp.float32),
    }


def init_params(key, E, H, FF, N):
    layer = _init_layer(key, E, H, FF)
    # clones() = deepcopy of the SAME initialized layer -> identical weights.
    return {"layers": [layer for _ in range(N)],
            "norm_g": jnp.ones((E,), jnp.float32),
            "norm_b": jnp.zeros((E,), jnp.float32)}


# ----------------------------------- main -----------------------------------

if __name__ == "__main__":
    B, T, S, E, H, FF, N = 2, 8, 8, 32, 4, 64, 2

    params = init_params(jax.random.PRNGKey(42), E, H, FF, N)

    key = jax.random.PRNGKey(0)
    k1, k2, k3 = jax.random.split(key, 3)
    x = jax.random.normal(k1, (B, T, E), jnp.float32)          # target embeddings
    encoded = jax.random.normal(k2, (B, S, E), jnp.float32)    # encoder output
    memory = [jax.random.normal(k3, (B, S, E), jnp.float32)]   # extra memory (eval path)
    memory_masks = [jnp.zeros((B, S), dtype=bool)]             # no padding in memory

    src_padding_mask = jnp.zeros((B, S), dtype=bool).at[:, -2:].set(True)
    tgt_padding_mask = jnp.zeros((B, T), dtype=bool)
    # causal additive mask (0 where allowed, -1e9 where masked)
    tgt_mask = jnp.where(jnp.tril(jnp.ones((T, T), dtype=bool)),
                         0.0, NEG_INF).astype(jnp.float32)

    out = manual_decoder_forward(params, x, encoded, memory, memory_masks,
                                 src_padding_mask, tgt_mask, tgt_padding_mask,
                                 training=False)
    jax.block_until_ready(out)
    assert out.shape == (B, T, E) and bool(jnp.all(jnp.isfinite(out)))
    print("KERNEL_OK")
</pallas_src>

<mosaic_0001>
module attributes {stable_mosaic.version = 11 : i64} {
  func.func @_decoder_layer_kernel(%arg0: i32, %arg1: memref<1x8x32xf32, #tpu.memory_space<vmem>>, %arg2: memref<1x8x32xf32, #tpu.memory_space<vmem>>, %arg3: memref<1x8x8xf32, #tpu.memory_space<vmem>>, %arg4: memref<1x8x8xf32, #tpu.memory_space<vmem>>, %arg5: memref<32x96xf32, #tpu.memory_space<vmem>>, %arg6: memref<1x96xf32, #tpu.memory_space<vmem>>, %arg7: memref<32x32xf32, #tpu.memory_space<vmem>>, %arg8: memref<1x32xf32, #tpu.memory_space<vmem>>, %arg9: memref<32x32xf32, #tpu.memory_space<vmem>>, %arg10: memref<1x32xf32, #tpu.memory_space<vmem>>, %arg11: memref<32x64xf32, #tpu.memory_space<vmem>>, %arg12: memref<1x64xf32, #tpu.memory_space<vmem>>, %arg13: memref<32x32xf32, #tpu.memory_space<vmem>>, %arg14: memref<1x32xf32, #tpu.memory_space<vmem>>, %arg15: memref<32x64xf32, #tpu.memory_space<vmem>>, %arg16: memref<1x64xf32, #tpu.memory_space<vmem>>, %arg17: memref<64x32xf32, #tpu.memory_space<vmem>>, %arg18: memref<1x32xf32, #tpu.memory_space<vmem>>, %arg19: memref<3x32xf32, #tpu.memory_space<vmem>>, %arg20: memref<3x32xf32, #tpu.memory_space<vmem>>, %arg21: memref<1x8x32xf32, #tpu.memory_space<vmem>>) attributes {dimension_semantics = [#tpu.dimension_semantics<parallel>], iteration_bounds = array<i64: 2>, scalar_prefetch = 0 : i64, scratch_operands = 0 : i64, tpu.core_type = #tpu.core_type<tc>, window_params = [{transform_indices = @transform_0, window_bounds = array<i64: 1, 8, 32>}, {transform_indices = @transform_1, window_bounds = array<i64: 1, 8, 32>}, {transform_indices = @transform_2, window_bounds = array<i64: 1, 8, 8>}, {transform_indices = @transform_3, window_bounds = array<i64: 1, 8, 8>}, {pipeline_mode = #tpu.pipeline_mode<synchronous>, transform_indices = @transform_4, window_bounds = array<i64: 32, 96>}, {pipeline_mode = #tpu.pipeline_mode<synchronous>, transform_indices = @transform_5, window_bounds = array<i64: 1, 96>}, {pipeline_mode = #tpu.pipeline_mode<synchronous>, transform_indices = @transform_6, window_bounds = array<i64: 32, 32>}, {pipeline_mode = #tpu.pipeline_mode<synchronous>, transform_indices = @transform_7, window_bounds = array<i64: 1, 32>}, {pipeline_mode = #tpu.pipeline_mode<synchronous>, transform_indices = @transform_8, window_bounds = array<i64: 32, 32>}, {pipeline_mode = #tpu.pipeline_mode<synchronous>, transform_indices = @transform_9, window_bounds = array<i64: 1, 32>}, {pipeline_mode = #tpu.pipeline_mode<synchronous>, transform_indices = @transform_10, window_bounds = array<i64: 32, 64>}, {pipeline_mode = #tpu.pipeline_mode<synchronous>, transform_indices = @transform_11, window_bounds = array<i64: 1, 64>}, {pipeline_mode = #tpu.pipeline_mode<synchronous>, transform_indices = @transform_12, window_bounds = array<i64: 32, 32>}, {pipeline_mode = #tpu.pipeline_mode<synchronous>, transform_indices = @transform_13, window_bounds = array<i64: 1, 32>}, {pipeline_mode = #tpu.pipeline_mode<synchronous>, transform_indices = @transform_14, window_bounds = array<i64: 32, 64>}, {pipeline_mode = #tpu.pipeline_mode<synchronous>, transform_indices = @transform_15, window_bounds = array<i64: 1, 64>}, {pipeline_mode = #tpu.pipeline_mode<synchronous>, transform_indices = @transform_16, window_bounds = array<i64: 64, 32>}, {pipeline_mode = #tpu.pipeline_mode<synchronous>, transform_indices = @transform_17, window_bounds = array<i64: 1, 32>}, {pipeline_mode = #tpu.pipeline_mode<synchronous>, transform_indices = @transform_18, window_bounds = array<i64: 3, 32>}, {pipeline_mode = #tpu.pipeline_mode<synchronous>, transform_indices = @transform_19, window_bounds = array<i64: 3, 32>}, {transform_indices = @transform_20, window_bounds = array<i64: 1, 8, 32>}]} {
    %c0 = arith.constant 0 : index
    %c0_0 = arith.constant 0 : index
    %c0_1 = arith.constant 0 : index
    %0 = vector.load %arg1[%c0, %c0_0, %c0_1] : memref<1x8x32xf32, #tpu.memory_space<vmem>>, vector<1x8x32xf32>
    %1 = vector.shape_cast %0 : vector<1x8x32xf32> to vector<8x32xf32>
    %c0_2 = arith.constant 0 : index
    %c0_3 = arith.constant 0 : index
    %c0_4 = arith.constant 0 : index
    %2 = vector.load %arg2[%c0_2, %c0_3, %c0_4] : memref<1x8x32xf32, #tpu.memory_space<vmem>>, vector<1x8x32xf32>
    %3 = vector.shape_cast %2 : vector<1x8x32xf32> to vector<8x32xf32>
    %c0_5 = arith.constant 0 : index
    %c0_6 = arith.constant 0 : index
    %4 = vector.load %arg5[%c0_5, %c0_6] : memref<32x96xf32, #tpu.memory_space<vmem>>, vector<32x96xf32>
    %5 = arith.truncf %1 : vector<8x32xf32> to vector<8x32xbf16>
    %6 = arith.truncf %4 : vector<32x96xf32> to vector<32x96xbf16>
    %cst = arith.constant dense<0.000000e+00> : vector<8x96xf32>
    %7 = tpu.matmul %5, %6, %cst {dimension_numbers = #tpu.dot_dimension_numbers<[1], [0], [0], [1], [0, 0, 1, 1], [], []>} : vector<8x32xbf16>, vector<32x96xbf16>, vector<8x96xf32> -> vector<8x96xf32>
    %c0_7 = arith.constant 0 : index
    %c0_8 = arith.constant 0 : index
    %8 = vector.load %arg6[%c0_7, %c0_8] : memref<1x96xf32, #tpu.memory_space<vmem>>, vector<1x96xf32>
    %9 = vector.broadcast %8 : vector<1x96xf32> to vector<8x96xf32>
    %10 = arith.addf %7, %9 : vector<8x96xf32>
    %11 = vector.extract_strided_slice %10 {offsets = [0, 0], sizes = [8, 32], strides = [1, 1]} : vector<8x96xf32> to vector<8x32xf32>
    %12 = vector.extract_strided_slice %10 {offsets = [0, 32], sizes = [8, 32], strides = [1, 1]} : vector<8x96xf32> to vector<8x32xf32>
    %13 = vector.extract_strided_slice %10 {offsets = [0, 64], sizes = [8, 32], strides = [1, 1]} : vector<8x96xf32> to vector<8x32xf32>
    %c0_9 = arith.constant 0 : index
    %c0_10 = arith.constant 0 : index
    %c0_11 = arith.constant 0 : index
    %14 = vector.load %arg3[%c0_9, %c0_10, %c0_11] : memref<1x8x8xf32, #tpu.memory_space<vmem>>, vector<1x8x8xf32>
    %15 = vector.shape_cast %14 : vector<1x8x8xf32> to vector<8x8xf32>
    %cst_12 = arith.constant 0.000000e+00 : f32
    %16 = vector.broadcast %cst_12 : f32 to vector<8x32xf32>
    %17 = vector.extract_strided_slice %11 {offsets = [0, 0], sizes = [8, 8], strides = [1, 1]} : vector<8x32xf32> to vector<8x8xf32>
    %18 = vector.extract_strided_slice %12 {offsets = [0, 0], sizes = [8, 8], strides = [1, 1]} : vector<8x32xf32> to vector<8x8xf32>
    %19 = arith.truncf %17 : vector<8x8xf32> to vector<8x8xbf16>
    %20 = arith.truncf %18 : vector<8x8xf32> to vector<8x8xbf16>
    %cst_13 = arith.constant dense<0.000000e+00> : vector<8x8xf32>
    %21 = tpu.matmul %19, %20, %cst_13 {dimension_numbers = #tpu.dot_dimension_numbers<[1], [1], [0], [0], [0, 0, 1, 0], [], []>} : vector<8x8xbf16>, vector<8x8xbf16>, vector<8x8xf32> -> vector<8x8xf32>
    %cst_14 = arith.constant 0.353553385 : f32
    %22 = vector.broadcast %cst_14 : f32 to vector<8x8xf32>
    %23 = arith.mulf %21, %22 : vector<8x8xf32>
    %24 = arith.addf %23, %15 : vector<8x8xf32>
    %cst_15 = arith.constant dense<0xFF800000> : vector<8xf32>
    %25 = vector.multi_reduction <maximumf>, %24, %cst_15 [1] : vector<8x8xf32> to vector<8xf32>
    %26 = vector.shape_cast %25 : vector<8xf32> to vector<8x1xf32>
    %27 = vector.broadcast %26 : vector<8x1xf32> to vector<8x8xf32>
    %28 = arith.subf %24, %27 : vector<8x8xf32>
    %29 = math.exp %28 : vector<8x8xf32>
    %cst_16 = arith.constant dense<0.000000e+00> : vector<8xf32>
    %30 = vector.multi_reduction <add>, %29, %cst_16 [1] : vector<8x8xf32> to vector<8xf32>
    %31 = vector.shape_cast %30 : vector<8xf32> to vector<8x1xf32>
    %32 = tpu.reciprocal %31 {approx = true} : vector<8x1xf32> -> vector<8x1xf32>
    %33 = vector.broadcast %32 : vector<8x1xf32> to vector<8x8xf32>
    %34 = arith.mulf %29, %33 : vector<8x8xf32>
    %35 = vector.extract_strided_slice %13 {offsets = [0, 0], sizes = [8, 8], strides = [1, 1]} : vector<8x32xf32> to vector<8x8xf32>
    %36 = arith.truncf %34 : vector<8x8xf32> to vector<8x8xbf16>
    %37 = arith.truncf %35 : vector<8x8xf32> to vector<8x8xbf16>
    %cst_17 = arith.constant dense<0.000000e+00> : vector<8x8xf32>
    %38 = tpu.matmul %36, %37, %cst_17 {dimension_numbers = #tpu.dot_dimension_numbers<[1], [0], [0], [1], [0, 0, 1, 1], [], []>} : vector<8x8xbf16>, vector<8x8xbf16>, vector<8x8xf32> -> vector<8x8xf32>
    %c0_18 = arith.constant 0 : index
    %c0_19 = arith.constant 0 : index
    %39 = vector.load %arg7[%c0_18, %c0_19] : memref<32x32xf32, #tpu.memory_space<vmem>>, vector<8x32xf32>
    %40 = arith.truncf %38 : vector<8x8xf32> to vector<8x8xbf16>
    %41 = arith.truncf %39 : vector<8x32xf32> to vector<8x32xbf16>
    %cst_20 = arith.constant dense<0.000000e+00> : vector<8x32xf32>
    %42 = tpu.matmul %40, %41, %cst_20 {dimension_numbers = #tpu.dot_dimension_numbers<[1], [0], [0], [1], [0, 0, 1, 1], [], []>} : vector<8x8xbf16>, vector<8x32xbf16>, vector<8x32xf32> -> vector<8x32xf32>
    %43 = arith.addf %16, %42 : vector<8x32xf32>
    %44 = vector.extract_strided_slice %11 {offsets = [0, 8], sizes = [8, 8], strides = [1, 1]} : vector<8x32xf32> to vector<8x8xf32>
    %45 = vector.extract_strided_slice %12 {offsets = [0, 8], sizes = [8, 8], strides = [1, 1]} : vector<8x32xf32> to vector<8x8xf32>
    %46 = arith.truncf %44 : vector<8x8xf32> to vector<8x8xbf16>
    %47 = arith.truncf %45 : vector<8x8xf32> to vector<8x8xbf16>
    %cst_21 = arith.constant dense<0.000000e+00> : vector<8x8xf32>
    %48 = tpu.matmul %46, %47, %cst_21 {dimension_numbers = #tpu.dot_dimension_numbers<[1], [1], [0], [0], [0, 0, 1, 0], [], []>} : vector<8x8xbf16>, vector<8x8xbf16>, vector<8x8xf32> -> vector<8x8xf32>
    %cst_22 = arith.constant 0.353553385 : f32
    %49 = vector.broadcast %cst_22 : f32 to vector<8x8xf32>
    %50 = arith.mulf %48, %49 : vector<8x8xf32>
    %51 = arith.addf %50, %15 : vector<8x8xf32>
    %cst_23 = arith.constant dense<0xFF800000> : vector<8xf32>
    %52 = vector.multi_reduction <maximumf>, %51, %cst_23 [1] : vector<8x8xf32> to vector<8xf32>
    %53 = vector.shape_cast %52 : vector<8xf32> to vector<8x1xf32>
    %54 = vector.broadcast %53 : vector<8x1xf32> to vector<8x8xf32>
    %55 = arith.subf %51, %54 : vector<8x8xf32>
    %56 = math.exp %55 : vector<8x8xf32>
    %cst_24 = arith.constant dense<0.000000e+00> : vector<8xf32>
    %57 = vector.multi_reduction <add>, %56, %cst_24 [1] : vector<8x8xf32> to vector<8xf32>
    %58 = vector.shape_cast %57 : vector<8xf32> to vector<8x1xf32>
    %59 = tpu.reciprocal %58 {approx = true} : vector<8x1xf32> -> vector<8x1xf32>
    %60 = vector.broadcast %59 : vector<8x1xf32> to vector<8x8xf32>
    %61 = arith.mulf %56, %60 : vector<8x8xf32>
    %62 = vector.extract_strided_slice %13 {offsets = [0, 8], sizes = [8, 8], strides = [1, 1]} : vector<8x32xf32> to vector<8x8xf32>
    %63 = arith.truncf %61 : vector<8x8xf32> to vector<8x8xbf16>
    %64 = arith.truncf %62 : vector<8x8xf32> to vector<8x8xbf16>
    %cst_25 = arith.constant dense<0.000000e+00> : vector<8x8xf32>
    %65 = tpu.matmul %63, %64, %cst_25 {dimension_numbers = #tpu.dot_dimension_numbers<[1], [0], [0], [1], [0, 0, 1, 1], [], []>} : vector<8x8xbf16>, vector<8x8xbf16>, vector<8x8xf32> -> vector<8x8xf32>
    %c8 = arith.constant 8 : index
    %c0_26 = arith.constant 0 : index
    %66 = vector.load %arg7[%c8, %c0_26] : memref<32x32xf32, #tpu.memory_space<vmem>>, vector<8x32xf32>
    %67 = arith.truncf %65 : vector<8x8xf32> to vector<8x8xbf16>
    %68 = arith.truncf %66 : vector<8x32xf32> to vector<8x32xbf16>
    %cst_27 = arith.constant dense<0.000000e+00> : vector<8x32xf32>
    %69 = tpu.matmul %67, %68, %cst_27 {dimension_numbers = #tpu.dot_dimension_numbers<[1], [0], [0], [1], [0, 0, 1, 1], [], []>} : vector<8x8xbf16>, vector<8x32xbf16>, vector<8x32xf32> -> vector<8x32xf32>
    %70 = arith.addf %43, %69 : vector<8x32xf32>
    %71 = vector.extract_strided_slice %11 {offsets = [0, 16], sizes = [8, 8], strides = [1, 1]} : vector<8x32xf32> to vector<8x8xf32>
    %72 = vector.extract_strided_slice %12 {offsets = [0, 16], sizes = [8, 8], strides = [1, 1]} : vector<8x32xf32> to vector<8x8xf32>
    %73 = arith.truncf %71 : vector<8x8xf32> to vector<8x8xbf16>
    %74 = arith.truncf %72 : vector<8x8xf32> to vector<8x8xbf16>
    %cst_28 = arith.constant dense<0.000000e+00> : vector<8x8xf32>
    %75 = tpu.matmul %73, %74, %cst_28 {dimension_numbers = #tpu.dot_dimension_numbers<[1], [1], [0], [0], [0, 0, 1, 0], [], []>} : vector<8x8xbf16>, vector<8x8xbf16>, vector<8x8xf32> -> vector<8x8xf32>
    %cst_29 = arith.constant 0.353553385 : f32
    %76 = vector.broadcast %cst_29 : f32 to vector<8x8xf32>
    %77 = arith.mulf %75, %76 : vector<8x8xf32>
    %78 = arith.addf %77, %15 : vector<8x8xf32>
    %cst_30 = arith.constant dense<0xFF800000> : vector<8xf32>
    %79 = vector.multi_reduction <maximumf>, %78, %cst_30 [1] : vector<8x8xf32> to vector<8xf32>
    %80 = vector.shape_cast %79 : vector<8xf32> to vector<8x1xf32>
    %81 = vector.broadcast %80 : vector<8x1xf32> to vector<8x8xf32>
    %82 = arith.subf %78, %81 : vector<8x8xf32>
    %83 = math.exp %82 : vector<8x8xf32>
    %cst_31 = arith.constant dense<0.000000e+00> : vector<8xf32>
    %84 = vector.multi_reduction <add>, %83, %cst_31 [1] : vector<8x8xf32> to vector<8xf32>
    %85 = vector.shape_cast %84 : vector<8xf32> to vector<8x1xf32>
    %86 = tpu.reciprocal %85 {approx = true} : vector<8x1xf32> -> vector<8x1xf32>
    %87 = vector.broadcast %86 : vector<8x1xf32> to vector<8x8xf32>
    %88 = arith.mulf %83, %87 : vector<8x8xf32>
    %89 = vector.extract_strided_slice %13 {offsets = [0, 16], sizes = [8, 8], strides = [1, 1]} : vector<8x32xf32> to vector<8x8xf32>
    %90 = arith.truncf %88 : vector<8x8xf32> to vector<8x8xbf16>
    %91 = arith.truncf %89 : vector<8x8xf32> to vector<8x8xbf16>
    %cst_32 = arith.constant dense<0.000000e+00> : vector<8x8xf32>
    %92 = tpu.matmul %90, %91, %cst_32 {dimension_numbers = #tpu.dot_dimension_numbers<[1], [0], [0], [1], [0, 0, 1, 1], [], []>} : vector<8x8xbf16>, vector<8x8xbf16>, vector<8x8xf32> -> vector<8x8xf32>
    %c16 = arith.constant 16 : index
    %c0_33 = arith.constant 0 : index
    %93 = vector.load %arg7[%c16, %c0_33] : memref<32x32xf32, #tpu.memory_space<vmem>>, vector<8x32xf32>
    %94 = arith.truncf %92 : vector<8x8xf32> to vector<8x8xbf16>
    %95 = arith.truncf %93 : vector<8x32xf32> to vector<8x32xbf16>
    %cst_34 = arith.constant dense<0.000000e+00> : vector<8x32xf32>
    %96 = tpu.matmul %94, %95, %cst_34 {dimension_numbers = #tpu.dot_dimension_numbers<[1], [0], [0], [1], [0, 0, 1, 1], [], []>} : vector<8x8xbf16>, vector<8x32xbf16>, vector<8x32xf32> -> vector<8x32xf32>
    %97 = arith.addf %70, %96 : vector<8x32xf32>
    %98 = vector.extract_strided_slice %11 {offsets = [0, 24], sizes = [8, 8], strides = [1, 1]} : vector<8x32xf32> to vector<8x8xf32>
    %99 = vector.extract_strided_slice %12 {offsets = [0, 24], sizes = [8, 8], strides = [1, 1]} : vector<8x32xf32> to vector<8x8xf32>
    %100 = arith.truncf %98 : vector<8x8xf32> to vector<8x8xbf16>
    %101 = arith.truncf %99 : vector<8x8xf32> to vector<8x8xbf16>
    %cst_35 = arith.constant dense<0.000000e+00> : vector<8x8xf32>
    %102 = tpu.matmul %100, %101, %cst_35 {dimension_numbers = #tpu.dot_dimension_numbers<[1], [1], [0], [0], [0, 0, 1, 0], [], []>} : vector<8x8xbf16>, vector<8x8xbf16>, vector<8x8xf32> -> vector<8x8xf32>
    %cst_36 = arith.constant 0.353553385 : f32
    %103 = vector.broadcast %cst_36 : f32 to vector<8x8xf32>
    %104 = arith.mulf %102, %103 : vector<8x8xf32>
    %105 = arith.addf %104, %15 : vector<8x8xf32>
    %cst_37 = arith.constant dense<0xFF800000> : vector<8xf32>
    %106 = vector.multi_reduction <maximumf>, %105, %cst_37 [1] : vector<8x8xf32> to vector<8xf32>
    %107 = vector.shape_cast %106 : vector<8xf32> to vector<8x1xf32>
    %108 = vector.broadcast %107 : vector<8x1xf32> to vector<8x8xf32>
    %109 = arith.subf %105, %108 : vector<8x8xf32>
    %110 = math.exp %109 : vector<8x8xf32>
    %cst_38 = arith.constant dense<0.000000e+00> : vector<8xf32>
    %111 = vector.multi_reduction <add>, %110, %cst_38 [1] : vector<8x8xf32> to vector<8xf32>
    %112 = vector.shape_cast %111 : vector<8xf32> to vector<8x1xf32>
    %113 = tpu.reciprocal %112 {approx = true} : vector<8x1xf32> -> vector<8x1xf32>
    %114 = vector.broadcast %113 : vector<8x1xf32> to vector<8x8xf32>
    %115 = arith.mulf %110, %114 : vector<8x8xf32>
    %116 = vector.extract_strided_slice %13 {offsets = [0, 24], sizes = [8, 8], strides = [1, 1]} : vector<8x32xf32> to vector<8x8xf32>
    %117 = arith.truncf %115 : vector<8x8xf32> to vector<8x8xbf16>
    %118 = arith.truncf %116 : vector<8x8xf32> to vector<8x8xbf16>
    %cst_39 = arith.constant dense<0.000000e+00> : vector<8x8xf32>
    %119 = tpu.matmul %117, %118, %cst_39 {dimension_numbers = #tpu.dot_dimension_numbers<[1], [0], [0], [1], [0, 0, 1, 1], [], []>} : vector<8x8xbf16>, vector<8x8xbf16>, vector<8x8xf32> -> vector<8x8xf32>
    %c24 = arith.constant 24 : index
    %c0_40 = arith.constant 0 : index
    %120 = vector.load %arg7[%c24, %c0_40] : memref<32x32xf32, #tpu.memory_space<vmem>>, vector<8x32xf32>
    %121 = arith.truncf %119 : vector<8x8xf32> to vector<8x8xbf16>
    %122 = arith.truncf %120 : vector<8x32xf32> to vector<8x32xbf16>
    %cst_41 = arith.constant dense<0.000000e+00> : vector<8x32xf32>
    %123 = tpu.matmul %121, %122, %cst_41 {dimension_numbers = #tpu.dot_dimension_numbers<[1], [0], [0], [1], [0, 0, 1, 1], [], []>} : vector<8x8xbf16>, vector<8x32xbf16>, vector<8x32xf32> -> vector<8x32xf32>
    %124 = arith.addf %97, %123 : vector<8x32xf32>
    %c0_42 = arith.constant 0 : index
    %c0_43 = arith.constant 0 : index
    %125 = vector.load %arg8[%c0_42, %c0_43] : memref<1x32xf32, #tpu.memory_space<vmem>>, vector<1x32xf32>
    %126 = vector.broadcast %125 : vector<1x32xf32> to vector<8x32xf32>
    %127 = arith.addf %124, %126 : vector<8x32xf32>
    %128 = arith.addf %1, %127 : vector<8x32xf32>
    %cst_44 = arith.constant dense<0.000000e+00> : vector<8xf32>
    %129 = vector.multi_reduction <add>, %128, %cst_44 [1] : vector<8x32xf32> to vector<8xf32>
    %130 = vector.shape_cast %129 : vector<8xf32> to vector<8x1xf32>
    %cst_45 = arith.constant 3.200000e+01 : f32
    %131 = vector.broadcast %cst_45 : f32 to vector<8x1xf32>
    %132 = arith.divf %130, %131 : vector<8x1xf32>
    %133 = vector.broadcast %132 : vector<8x1xf32> to vector<8x32xf32>
    %134 = arith.subf %128, %133 : vector<8x32xf32>
    %135 = arith.mulf %134, %134 : vector<8x32xf32>
    %cst_46 = arith.constant dense<0.000000e+00> : vector<8xf32>
    %136 = vector.multi_reduction <add>, %135, %cst_46 [1] : vector<8x32xf32> to vector<8xf32>
    %137 = vector.shape_cast %136 : vector<8xf32> to vector<8x1xf32>
    %cst_47 = arith.constant 3.200000e+01 : f32
    %138 = vector.broadcast %cst_47 : f32 to vector<8x1xf32>
    %139 = arith.divf %137, %138 : vector<8x1xf32>
    %c0_48 = arith.constant 0 : index
    %c0_49 = arith.constant 0 : index
    %140 = vector.load %arg19[%c0_48, %c0_49] : memref<3x32xf32, #tpu.memory_space<vmem>>, vector<1x32xf32>
    %c0_50 = arith.constant 0 : index
    %c0_51 = arith.constant 0 : index
    %141 = vector.load %arg20[%c0_50, %c0_51] : memref<3x32xf32, #tpu.memory_space<vmem>>, vector<1x32xf32>
    %142 = vector.broadcast %132 : vector<8x1xf32> to vector<8x32xf32>
    %143 = arith.subf %128, %142 : vector<8x32xf32>
    %cst_52 = arith.constant 9.99999974E-6 : f32
    %144 = vector.broadcast %cst_52 : f32 to vector<8x1xf32>
    %145 = arith.addf %139, %144 : vector<8x1xf32>
    %146 = math.rsqrt %145 : vector<8x1xf32>
    %147 = vector.broadcast %146 : vector<8x1xf32> to vector<8x32xf32>
    %148 = arith.mulf %143, %147 : vector<8x32xf32>
    %149 = vector.broadcast %140 : vector<1x32xf32> to vector<8x32xf32>
    %150 = arith.mulf %148, %149 : vector<8x32xf32>
    %151 = vector.broadcast %141 : vector<1x32xf32> to vector<8x32xf32>
    %152 = arith.addf %150, %151 : vector<8x32xf32>
    %c0_53 = arith.constant 0 : index
    %c0_54 = arith.constant 0 : index
    %153 = vector.load %arg9[%c0_53, %c0_54] : memref<32x32xf32, #tpu.memory_space<vmem>>, vector<32x32xf32>
    %154 = arith.truncf %152 : vector<8x32xf32> to vector<8x32xbf16>
    %155 = arith.truncf %153 : vector<32x32xf32> to vector<32x32xbf16>
    %cst_55 = arith.constant dense<0.000000e+00> : vector<8x32xf32>
    %156 = tpu.matmul %154, %155, %cst_55 {dimension_numbers = #tpu.dot_dimension_numbers<[1], [0], [0], [1], [0, 0, 1, 1], [], []>} : vector<8x32xbf16>, vector<32x32xbf16>, vector<8x32xf32> -> vector<8x32xf32>
    %c0_56 = arith.constant 0 : index
    %c0_57 = arith.constant 0 : index
    %157 = vector.load %arg10[%c0_56, %c0_57] : memref<1x32xf32, #tpu.memory_space<vmem>>, vector<1x32xf32>
    %158 = vector.broadcast %157 : vector<1x32xf32> to vector<8x32xf32>
    %159 = arith.addf %156, %158 : vector<8x32xf32>
    %c0_58 = arith.constant 0 : index
    %c0_59 = arith.constant 0 : index
    %160 = vector.load %arg11[%c0_58, %c0_59] : memref<32x64xf32, #tpu.memory_space<vmem>>, vector<32x64xf32>
    %161 = arith.truncf %3 : vector<8x32xf32> to vector<8x32xbf16>
    %162 = arith.truncf %160 : vector<32x64xf32> to vector<32x64xbf16>
    %cst_60 = arith.constant dense<0.000000e+00> : vector<8x64xf32>
    %163 = tpu.matmul %161, %162, %cst_60 {dimension_numbers = #tpu.dot_dimension_numbers<[1], [0], [0], [1], [0, 0, 1, 1], [], []>} : vector<8x32xbf16>, vector<32x64xbf16>, vector<8x64xf32> -> vector<8x64xf32>
    %c0_61 = arith.constant 0 : index
    %c0_62 = arith.constant 0 : index
    %164 = vector.load %arg12[%c0_61, %c0_62] : memref<1x64xf32, #tpu.memory_space<vmem>>, vector<1x64xf32>
    %165 = vector.broadcast %164 : vector<1x64xf32> to vector<8x64xf32>
    %166 = arith.addf %163, %165 : vector<8x64xf32>
    %167 = vector.extract_strided_slice %166 {offsets = [0, 0], sizes = [8, 32], strides = [1, 1]} : vector<8x64xf32> to vector<8x32xf32>
    %168 = vector.extract_strided_slice %166 {offsets = [0, 32], sizes = [8, 32], strides = [1, 1]} : vector<8x64xf32> to vector<8x32xf32>
    %c0_63 = arith.constant 0 : index
    %c0_64 = arith.constant 0 : index
    %c0_65 = arith.constant 0 : index
    %169 = vector.load %arg4[%c0_63, %c0_64, %c0_65] : memref<1x8x8xf32, #tpu.memory_space<vmem>>, vector<1x8x8xf32>
    %170 = vector.shape_cast %169 : vector<1x8x8xf32> to vector<8x8xf32>
    %cst_66 = arith.constant 0.000000e+00 : f32
    %171 = vector.broadcast %cst_66 : f32 to vector<8x32xf32>
    %172 = vector.extract_strided_slice %159 {offsets = [0, 0], sizes = [8, 8], strides = [1, 1]} : vector<8x32xf32> to vector<8x8xf32>
    %173 = vector.extract_strided_slice %167 {offsets = [0, 0], sizes = [8, 8], strides = [1, 1]} : vector<8x32xf32> to vector<8x8xf32>
    %174 = arith.truncf %172 : vector<8x8xf32> to vector<8x8xbf16>
    %175 = arith.truncf %173 : vector<8x8xf32> to vector<8x8xbf16>
    %cst_67 = arith.constant dense<0.000000e+00> : vector<8x8xf32>
    %176 = tpu.matmul %174, %175, %cst_67 {dimension_numbers = #tpu.dot_dimension_numbers<[1], [1], [0], [0], [0, 0, 1, 0], [], []>} : vector<8x8xbf16>, vector<8x8xbf16>, vector<8x8xf32> -> vector<8x8xf32>
    %cst_68 = arith.constant 0.353553385 : f32
    %177 = vector.broadcast %cst_68 : f32 to vector<8x8xf32>
    %178 = arith.mulf %176, %177 : vector<8x8xf32>
    %179 = arith.addf %178, %170 : vector<8x8xf32>
    %cst_69 = arith.constant dense<0xFF800000> : vector<8xf32>
    %180 = vector.multi_reduction <maximumf>, %179, %cst_69 [1] : vector<8x8xf32> to vector<8xf32>
    %181 = vector.shape_cast %180 : vector<8xf32> to vector<8x1xf32>
    %182 = vector.broadcast %181 : vector<8x1xf32> to vector<8x8xf32>
    %183 = arith.subf %179, %182 : vector<8x8xf32>
    %184 = math.exp %183 : vector<8x8xf32>
    %cst_70 = arith.constant dense<0.000000e+00> : vector<8xf32>
    %185 = vector.multi_reduction <add>, %184, %cst_70 [1] : vector<8x8xf32> to vector<8xf32>
    %186 = vector.shape_cast %185 : vector<8xf32> to vector<8x1xf32>
    %187 = tpu.reciprocal %186 {approx = true} : vector<8x1xf32> -> vector<8x1xf32>
    %188 = vector.broadcast %187 : vector<8x1xf32> to vector<8x8xf32>
    %189 = arith.mulf %184, %188 : vector<8x8xf32>
    %190 = vector.extract_strided_slice %168 {offsets = [0, 0], sizes = [8, 8], strides = [1, 1]} : vector<8x32xf32> to vector<8x8xf32>
    %191 = arith.truncf %189 : vector<8x8xf32> to vector<8x8xbf16>
    %192 = arith.truncf %190 : vector<8x8xf32> to vector<8x8xbf16>
    %cst_71 = arith.constant dense<0.000000e+00> : vector<8x8xf32>
    %193 = tpu.matmul %191, %192, %cst_71 {dimension_numbers = #tpu.dot_dimension_numbers<[1], [0], [0], [1], [0, 0, 1, 1], [], []>} : vector<8x8xbf16>, vector<8x8xbf16>, vector<8x8xf32> -> vector<8x8xf32>
    %c0_72 = arith.constant 0 : index
    %c0_73 = arith.constant 0 : index
    %194 = vector.load %arg13[%c0_72, %c0_73] : memref<32x32xf32, #tpu.memory_space<vmem>>, vector<8x32xf32>
    %195 = arith.truncf %193 : vector<8x8xf32> to vector<8x8xbf16>
    %196 = arith.truncf %194 : vector<8x32xf32> to vector<8x32xbf16>
    %cst_74 = arith.constant dense<0.000000e+00> : vector<8x32xf32>
    %197 = tpu.matmul %195, %196, %cst_74 {dimension_numbers = #tpu.dot_dimension_numbers<[1], [0], [0], [1], [0, 0, 1, 1], [], []>} : vector<8x8xbf16>, vector<8x32xbf16>, vector<8x32xf32> -> vector<8x32xf32>
    %198 = arith.addf %171, %197 : vector<8x32xf32>
    %199 = vector.extract_strided_slice %159 {offsets = [0, 8], sizes = [8, 8], strides = [1, 1]} : vector<8x32xf32> to vector<8x8xf32>
    %200 = vector.extract_strided_slice %167 {offsets = [0, 8], sizes = [8, 8], strides = [1, 1]} : vector<8x32xf32> to vector<8x8xf32>
    %201 = arith.truncf %199 : vector<8x8xf32> to vector<8x8xbf16>
    %202 = arith.truncf %200 : vector<8x8xf32> to vector<8x8xbf16>
    %cst_75 = arith.constant dense<0.000000e+00> : vector<8x8xf32>
    %203 = tpu.matmul %201, %202, %cst_75 {dimension_numbers = #tpu.dot_dimension_numbers<[1], [1], [0], [0], [0, 0, 1, 0], [], []>} : vector<8x8xbf16>, vector<8x8xbf16>, vector<8x8xf32> -> vector<8x8xf32>
    %cst_76 = arith.constant 0.353553385 : f32
    %204 = vector.broadcast %cst_76 : f32 to vector<8x8xf32>
    %205 = arith.mulf %203, %204 : vector<8x8xf32>
    %206 = arith.addf %205, %170 : vector<8x8xf32>
    %cst_77 = arith.constant dense<0xFF800000> : vector<8xf32>
    %207 = vector.multi_reduction <maximumf>, %206, %cst_77 [1] : vector<8x8xf32> to vector<8xf32>
    %208 = vector.shape_cast %207 : vector<8xf32> to vector<8x1xf32>
    %209 = vector.broadcast %208 : vector<8x1xf32> to vector<8x8xf32>
    %210 = arith.subf %206, %209 : vector<8x8xf32>
    %211 = math.exp %210 : vector<8x8xf32>
    %cst_78 = arith.constant dense<0.000000e+00> : vector<8xf32>
    %212 = vector.multi_reduction <add>, %211, %cst_78 [1] : vector<8x8xf32> to vector<8xf32>
    %213 = vector.shape_cast %212 : vector<8xf32> to vector<8x1xf32>
    %214 = tpu.reciprocal %213 {approx = true} : vector<8x1xf32> -> vector<8x1xf32>
    %215 = vector.broadcast %214 : vector<8x1xf32> to vector<8x8xf32>
    %216 = arith.mulf %211, %215 : vector<8x8xf32>
    %217 = vector.extract_strided_slice %168 {offsets = [0, 8], sizes = [8, 8], strides = [1, 1]} : vector<8x32xf32> to vector<8x8xf32>
    %218 = arith.truncf %216 : vector<8x8xf32> to vector<8x8xbf16>
    %219 = arith.truncf %217 : vector<8x8xf32> to vector<8x8xbf16>
    %cst_79 = arith.constant dense<0.000000e+00> : vector<8x8xf32>
    %220 = tpu.matmul %218, %219, %cst_79 {dimension_numbers = #tpu.dot_dimension_numbers<[1], [0], [0], [1], [0, 0, 1, 1], [], []>} : vector<8x8xbf16>, vector<8x8xbf16>, vector<8x8xf32> -> vector<8x8xf32>
    %c8_80 = arith.constant 8 : index
    %c0_81 = arith.constant 0 : index
    %221 = vector.load %arg13[%c8_80, %c0_81] : memref<32x32xf32, #tpu.memory_space<vmem>>, vector<8x32xf32>
    %222 = arith.truncf %220 : vector<8x8xf32> to vector<8x8xbf16>
    %223 = arith.truncf %221 : vector<8x32xf32> to vector<8x32xbf16>
    %cst_82 = arith.constant dense<0.000000e+00> : vector<8x32xf32>
    %224 = tpu.matmul %222, %223, %cst_82 {dimension_numbers = #tpu.dot_dimension_numbers<[1], [0], [0], [1], [0, 0, 1, 1], [], []>} : vector<8x8xbf16>, vector<8x32xbf16>, vector<8x32xf32> -> vector<8x32xf32>
    %225 = arith.addf %198, %224 : vector<8x32xf32>
    %226 = vector.extract_strided_slice %159 {offsets = [0, 16], sizes = [8, 8], strides = [1, 1]} : vector<8x32xf32> to vector<8x8xf32>
    %227 = vector.extract_strided_slice %167 {offsets = [0, 16], sizes = [8, 8], strides = [1, 1]} : vector<8x32xf32> to vector<8x8xf32>
    %228 = arith.truncf %226 : vector<8x8xf32> to vector<8x8xbf16>
    %229 = arith.truncf %227 : vector<8x8xf32> to vector<8x8xbf16>
    %cst_83 = arith.constant dense<0.000000e+00> : vector<8x8xf32>
    %230 = tpu.matmul %228, %229, %cst_83 {dimension_numbers = #tpu.dot_dimension_numbers<[1], [1], [0], [0], [0, 0, 1, 0], [], []>} : vector<8x8xbf16>, vector<8x8xbf16>, vector<8x8xf32> -> vector<8x8xf32>
    %cst_84 = arith.constant 0.353553385 : f32
    %231 = vector.broadcast %cst_84 : f32 to vector<8x8xf32>
    %232 = arith.mulf %230, %231 : vector<8x8xf32>
    %233 = arith.addf %232, %170 : vector<8x8xf32>
    %cst_85 = arith.constant dense<0xFF800000> : vector<8xf32>
    %234 = vector.multi_reduction <maximumf>, %233, %cst_85 [1] : vector<8x8xf32> to vector<8xf32>
    %235 = vector.shape_cast %234 : vector<8xf32> to vector<8x1xf32>
    %236 = vector.broadcast %235 : vector<8x1xf32> to vector<8x8xf32>
    %237 = arith.subf %233, %236 : vector<8x8xf32>
    %238 = math.exp %237 : vector<8x8xf32>
    %cst_86 = arith.constant dense<0.000000e+00> : vector<8xf32>
    %239 = vector.multi_reduction <add>, %238, %cst_86 [1] : vector<8x8xf32> to vector<8xf32>
    %240 = vector.shape_cast %239 : vector<8xf32> to vector<8x1xf32>
    %241 = tpu.reciprocal %240 {approx = true} : vector<8x1xf32> -> vector<8x1xf32>
    %242 = vector.broadcast %241 : vector<8x1xf32> to vector<8x8xf32>
    %243 = arith.mulf %238, %242 : vector<8x8xf32>
    %244 = vector.extract_strided_slice %168 {offsets = [0, 16], sizes = [8, 8], strides = [1, 1]} : vector<8x32xf32> to vector<8x8xf32>
    %245 = arith.truncf %243 : vector<8x8xf32> to vector<8x8xbf16>
    %246 = arith.truncf %244 : vector<8x8xf32> to vector<8x8xbf16>
    %cst_87 = arith.constant dense<0.000000e+00> : vector<8x8xf32>
    %247 = tpu.matmul %245, %246, %cst_87 {dimension_numbers = #tpu.dot_dimension_numbers<[1], [0], [0], [1], [0, 0, 1, 1], [], []>} : vector<8x8xbf16>, vector<8x8xbf16>, vector<8x8xf32> -> vector<8x8xf32>
    %c16_88 = arith.constant 16 : index
    %c0_89 = arith.constant 0 : index
    %248 = vector.load %arg13[%c16_88, %c0_89] : memref<32x32xf32, #tpu.memory_space<vmem>>, vector<8x32xf32>
    %249 = arith.truncf %247 : vector<8x8xf32> to vector<8x8xbf16>
    %250 = arith.truncf %248 : vector<8x32xf32> to vector<8x32xbf16>
    %cst_90 = arith.constant dense<0.000000e+00> : vector<8x32xf32>
    %251 = tpu.matmul %249, %250, %cst_90 {dimension_numbers = #tpu.dot_dimension_numbers<[1], [0], [0], [1], [0, 0, 1, 1], [], []>} : vector<8x8xbf16>, vector<8x32xbf16>, vector<8x32xf32> -> vector<8x32xf32>
    %252 = arith.addf %225, %251 : vector<8x32xf32>
    %253 = vector.extract_strided_slice %159 {offsets = [0, 24], sizes = [8, 8], strides = [1, 1]} : vector<8x32xf32> to vector<8x8xf32>
    %254 = vector.extract_strided_slice %167 {offsets = [0, 24], sizes = [8, 8], strides = [1, 1]} : vector<8x32xf32> to vector<8x8xf32>
    %255 = arith.truncf %253 : vector<8x8xf32> to vector<8x8xbf16>
    %256 = arith.truncf %254 : vector<8x8xf32> to vector<8x8xbf16>
    %cst_91 = arith.constant dense<0.000000e+00> : vector<8x8xf32>
    %257 = tpu.matmul %255, %256, %cst_91 {dimension_numbers = #tpu.dot_dimension_numbers<[1], [1], [0], [0], [0, 0, 1, 0], [], []>} : vector<8x8xbf16>, vector<8x8xbf16>, vector<8x8xf32> -> vector<8x8xf32>
    %cst_92 = arith.constant 0.353553385 : f32
    %258 = vector.broadcast %cst_92 : f32 to vector<8x8xf32>
    %259 = arith.mulf %257, %258 : vector<8x8xf32>
    %260 = arith.addf %259, %170 : vector<8x8xf32>
    %cst_93 = arith.constant dense<0xFF800000> : vector<8xf32>
    %261 = vector.multi_reduction <maximumf>, %260, %cst_93 [1] : vector<8x8xf32> to vector<8xf32>
    %262 = vector.shape_cast %261 : vector<8xf32> to vector<8x1xf32>
    %263 = vector.broadcast %262 : vector<8x1xf32> to vector<8x8xf32>
    %264 = arith.subf %260, %263 : vector<8x8xf32>
    %265 = math.exp %264 : vector<8x8xf32>
    %cst_94 = arith.constant dense<0.000000e+00> : vector<8xf32>
    %266 = vector.multi_reduction <add>, %265, %cst_94 [1] : vector<8x8xf32> to vector<8xf32>
    %267 = vector.shape_cast %266 : vector<8xf32> to vector<8x1xf32>
    %268 = tpu.reciprocal %267 {approx = true} : vector<8x1xf32> -> vector<8x1xf32>
    %269 = vector.broadcast %268 : vector<8x1xf32> to vector<8x8xf32>
    %270 = arith.mulf %265, %269 : vector<8x8xf32>
    %271 = vector.extract_strided_slice %168 {offsets = [0, 24], sizes = [8, 8], strides = [1, 1]} : vector<8x32xf32> to vector<8x8xf32>
    %272 = arith.truncf %270 : vector<8x8xf32> to vector<8x8xbf16>
    %273 = arith.truncf %271 : vector<8x8xf32> to vector<8x8xbf16>
    %cst_95 = arith.constant dense<0.000000e+00> : vector<8x8xf32>
    %274 = tpu.matmul %272, %273, %cst_95 {dimension_numbers = #tpu.dot_dimension_numbers<[1], [0], [0], [1], [0, 0, 1, 1], [], []>} : vector<8x8xbf16>, vector<8x8xbf16>, vector<8x8xf32> -> vector<8x8xf32>
    %c24_96 = arith.constant 24 : index
    %c0_97 = arith.constant 0 : index
    %275 = vector.load %arg13[%c24_96, %c0_97] : memref<32x32xf32, #tpu.memory_space<vmem>>, vector<8x32xf32>
    %276 = arith.truncf %274 : vector<8x8xf32> to vector<8x8xbf16>
    %277 = arith.truncf %275 : vector<8x32xf32> to vector<8x32xbf16>
    %cst_98 = arith.constant dense<0.000000e+00> : vector<8x32xf32>
    %278 = tpu.matmul %276, %277, %cst_98 {dimension_numbers = #tpu.dot_dimension_numbers<[1], [0], [0], [1], [0, 0, 1, 1], [], []>} : vector<8x8xbf16>, vector<8x32xbf16>, vector<8x32xf32> -> vector<8x32xf32>
    %279 = arith.addf %252, %278 : vector<8x32xf32>
    %c0_99 = arith.constant 0 : index
    %c0_100 = arith.constant 0 : index
    %280 = vector.load %arg14[%c0_99, %c0_100] : memref<1x32xf32, #tpu.memory_space<vmem>>, vector<1x32xf32>
    %281 = vector.broadcast %280 : vector<1x32xf32> to vector<8x32xf32>
    %282 = arith.addf %279, %281 : vector<8x32xf32>
    %283 = arith.addf %152, %282 : vector<8x32xf32>
    %cst_101 = arith.constant dense<0.000000e+00> : vector<8xf32>
    %284 = vector.multi_reduction <add>, %283, %cst_101 [1] : vector<8x32xf32> to vector<8xf32>
    %285 = vector.shape_cast %284 : vector<8xf32> to vector<8x1xf32>
    %cst_102 = arith.constant 3.200000e+01 : f32
    %286 = vector.broadcast %cst_102 : f32 to vector<8x1xf32>
    %287 = arith.divf %285, %286 : vector<8x1xf32>
    %288 = vector.broadcast %287 : vector<8x1xf32> to vector<8x32xf32>
    %289 = arith.subf %283, %288 : vector<8x32xf32>
    %290 = arith.mulf %289, %289 : vector<8x32xf32>
    %cst_103 = arith.constant dense<0.000000e+00> : vector<8xf32>
    %291 = vector.multi_reduction <add>, %290, %cst_103 [1] : vector<8x32xf32> to vector<8xf32>
    %292 = vector.shape_cast %291 : vector<8xf32> to vector<8x1xf32>
    %cst_104 = arith.constant 3.200000e+01 : f32
    %293 = vector.broadcast %cst_104 : f32 to vector<8x1xf32>
    %294 = arith.divf %292, %293 : vector<8x1xf32>
    %c1 = arith.constant 1 : index
    %c0_105 = arith.constant 0 : index
    %295 = vector.load %arg19[%c1, %c0_105] : memref<3x32xf32, #tpu.memory_space<vmem>>, vector<1x32xf32>
    %c1_106 = arith.constant 1 : index
    %c0_107 = arith.constant 0 : index
    %296 = vector.load %arg20[%c1_106, %c0_107] : memref<3x32xf32, #tpu.memory_space<vmem>>, vector<1x32xf32>
    %297 = vector.broadcast %287 : vector<8x1xf32> to vector<8x32xf32>
    %298 = arith.subf %283, %297 : vector<8x32xf32>
    %cst_108 = arith.constant 9.99999974E-6 : f32
    %299 = vector.broadcast %cst_108 : f32 to vector<8x1xf32>
    %300 = arith.addf %294, %299 : vector<8x1xf32>
    %301 = math.rsqrt %300 : vector<8x1xf32>
    %302 = vector.broadcast %301 : vector<8x1xf32> to vector<8x32xf32>
    %303 = arith.mulf %298, %302 : vector<8x32xf32>
    %304 = vector.broadcast %295 : vector<1x32xf32> to vector<8x32xf32>
    %305 = arith.mulf %303, %304 : vector<8x32xf32>
    %306 = vector.broadcast %296 : vector<1x32xf32> to vector<8x32xf32>
    %307 = arith.addf %305, %306 : vector<8x32xf32>
    %c0_109 = arith.constant 0 : index
    %c0_110 = arith.constant 0 : index
    %308 = vector.load %arg15[%c0_109, %c0_110] : memref<32x64xf32, #tpu.memory_space<vmem>>, vector<32x64xf32>
    %309 = arith.truncf %307 : vector<8x32xf32> to vector<8x32xbf16>
    %310 = arith.truncf %308 : vector<32x64xf32> to vector<32x64xbf16>
    %cst_111 = arith.constant dense<0.000000e+00> : vector<8x64xf32>
    %311 = tpu.matmul %309, %310, %cst_111 {dimension_numbers = #tpu.dot_dimension_numbers<[1], [0], [0], [1], [0, 0, 1, 1], [], []>} : vector<8x32xbf16>, vector<32x64xbf16>, vector<8x64xf32> -> vector<8x64xf32>
    %c0_112 = arith.constant 0 : index
    %c0_113 = arith.constant 0 : index
    %312 = vector.load %arg16[%c0_112, %c0_113] : memref<1x64xf32, #tpu.memory_space<vmem>>, vector<1x64xf32>
    %313 = vector.broadcast %312 : vector<1x64xf32> to vector<8x64xf32>
    %314 = arith.addf %311, %313 : vector<8x64xf32>
    %cst_114 = arith.constant 0.000000e+00 : f32
    %315 = vector.broadcast %cst_114 : f32 to vector<8x64xf32>
    %316 = arith.maximumf %314, %315 : vector<8x64xf32>
    %c0_115 = arith.constant 0 : index
    %c0_116 = arith.constant 0 : index
    %317 = vector.load %arg17[%c0_115, %c0_116] : memref<64x32xf32, #tpu.memory_space<vmem>>, vector<64x32xf32>
    %318 = arith.truncf %316 : vector<8x64xf32> to vector<8x64xbf16>
    %319 = arith.truncf %317 : vector<64x32xf32> to vector<64x32xbf16>
    %cst_117 = arith.constant dense<0.000000e+00> : vector<8x32xf32>
    %320 = tpu.matmul %318, %319, %cst_117 {dimension_numbers = #tpu.dot_dimension_numbers<[1], [0], [0], [1], [0, 0, 1, 1], [], []>} : vector<8x64xbf16>, vector<64x32xbf16>, vector<8x32xf32> -> vector<8x32xf32>
    %c0_118 = arith.constant 0 : index
    %c0_119 = arith.constant 0 : index
    %321 = vector.load %arg18[%c0_118, %c0_119] : memref<1x32xf32, #tpu.memory_space<vmem>>, vector<1x32xf32>
    %322 = vector.broadcast %321 : vector<1x32xf32> to vector<8x32xf32>
    %323 = arith.addf %320, %322 : vector<8x32xf32>
    %324 = arith.addf %307, %323 : vector<8x32xf32>
    %cst_120 = arith.constant dense<0.000000e+00> : vector<8xf32>
    %325 = vector.multi_reduction <add>, %324, %cst_120 [1] : vector<8x32xf32> to vector<8xf32>
    %326 = vector.shape_cast %325 : vector<8xf32> to vector<8x1xf32>
    %cst_121 = arith.constant 3.200000e+01 : f32
    %327 = vector.broadcast %cst_121 : f32 to vector<8x1xf32>
    %328 = arith.divf %326, %327 : vector<8x1xf32>
    %329 = vector.broadcast %328 : vector<8x1xf32> to vector<8x32xf32>
    %330 = arith.subf %324, %329 : vector<8x32xf32>
    %331 = arith.mulf %330, %330 : vector<8x32xf32>
    %cst_122 = arith.constant dense<0.000000e+00> : vector<8xf32>
    %332 = vector.multi_reduction <add>, %331, %cst_122 [1] : vector<8x32xf32> to vector<8xf32>
    %333 = vector.shape_cast %332 : vector<8xf32> to vector<8x1xf32>
    %cst_123 = arith.constant 3.200000e+01 : f32
    %334 = vector.broadcast %cst_123 : f32 to vector<8x1xf32>
    %335 = arith.divf %333, %334 : vector<8x1xf32>
    %c2 = arith.constant 2 : index
    %c0_124 = arith.constant 0 : index
    %336 = vector.load %arg19[%c2, %c0_124] : memref<3x32xf32, #tpu.memory_space<vmem>>, vector<1x32xf32>
    %c2_125 = arith.constant 2 : index
    %c0_126 = arith.constant 0 : index
    %337 = vector.load %arg20[%c2_125, %c0_126] : memref<3x32xf32, #tpu.memory_space<vmem>>, vector<1x32xf32>
    %338 = vector.broadcast %328 : vector<8x1xf32> to vector<8x32xf32>
    %339 = arith.subf %324, %338 : vector<8x32xf32>
    %cst_127 = arith.constant 9.99999974E-6 : f32
    %340 = vector.broadcast %cst_127 : f32 to vector<8x1xf32>
    %341 = arith.addf %335, %340 : vector<8x1xf32>
    %342 = math.rsqrt %341 : vector<8x1xf32>
    %343 = vector.broadcast %342 : vector<8x1xf32> to vector<8x32xf32>
    %344 = arith.mulf %339, %343 : vector<8x32xf32>
    %345 = vector.broadcast %336 : vector<1x32xf32> to vector<8x32xf32>
    %346 = arith.mulf %344, %345 : vector<8x32xf32>
    %347 = vector.broadcast %337 : vector<1x32xf32> to vector<8x32xf32>
    %348 = arith.addf %346, %347 : vector<8x32xf32>
    %c0_128 = arith.constant 0 : index
    %c0_129 = arith.constant 0 : index
    %c0_130 = arith.constant 0 : index
    %349 = vector.load %arg21[%c0_128, %c0_129, %c0_130] : memref<1x8x32xf32, #tpu.memory_space<vmem>>, vector<1x8x32xf32>
    %350 = vector.shape_cast %349 : vector<1x8x32xf32> to vector<8x32xf32>
    %351 = vector.shape_cast %348 : vector<8x32xf32> to vector<1x8x32xf32>
    tpu.vector_store %arg21[%c0_128, %c0_129, %c0_130], %351 {strides = array<i32>} : memref<1x8x32xf32, #tpu.memory_space<vmem>>, vector<1x8x32xf32>,
    return
  }
  func.func @transform_0(%arg0: i32) -> (i32, i32, i32) {
    %c0_i32 = arith.constant 0 : i32
    %c0_i32_0 = arith.constant 0 : i32
    %c0_i32_1 = arith.constant 0 : i32
    return %arg0, %c0_i32, %c0_i32_0 : i32, i32, i32
  }
  func.func @transform_1(%arg0: i32) -> (i32, i32, i32) {
    %c0_i32 = arith.constant 0 : i32
    %c0_i32_0 = arith.constant 0 : i32
    %c0_i32_1 = arith.constant 0 : i32
    return %arg0, %c0_i32, %c0_i32_0 : i32, i32, i32
  }
  func.func @transform_2(%arg0: i32) -> (i32, i32, i32) {
    %c0_i32 = arith.constant 0 : i32
    %c0_i32_0 = arith.constant 0 : i32
    %c0_i32_1 = arith.constant 0 : i32
    return %arg0, %c0_i32, %c0_i32_0 : i32, i32, i32
  }
  func.func @transform_3(%arg0: i32) -> (i32, i32, i32) {
    %c0_i32 = arith.constant 0 : i32
    %c0_i32_0 = arith.constant 0 : i32
    %c0_i32_1 = arith.constant 0 : i32
    return %arg0, %c0_i32, %c0_i32_0 : i32, i32, i32
  }
  func.func @transform_4(%arg0: i32) -> (i32, i32) {
    %c0_i32 = arith.constant 0 : i32
    %c0_i32_0 = arith.constant 0 : i32
    %c0_i32_1 = arith.constant 0 : i32
    return %c0_i32, %c0_i32_0 : i32, i32
  }
  func.func @transform_5(%arg0: i32) -> (i32, i32) {
    %c0_i32 = arith.constant 0 : i32
    %c0_i32_0 = arith.constant 0 : i32
    %c0_i32_1 = arith.constant 0 : i32
    return %c0_i32, %c0_i32_0 : i32, i32
  }
  func.func @transform_6(%arg0: i32) -> (i32, i32) {
    %c0_i32 = arith.constant 0 : i32
    %c0_i32_0 = arith.constant 0 : i32
    %c0_i32_1 = arith.constant 0 : i32
    return %c0_i32, %c0_i32_0 : i32, i32
  }
  func.func @transform_7(%arg0: i32) -> (i32, i32) {
    %c0_i32 = arith.constant 0 : i32
    %c0_i32_0 = arith.constant 0 : i32
    %c0_i32_1 = arith.constant 0 : i32
    return %c0_i32, %c0_i32_0 : i32, i32
  }
  func.func @transform_8(%arg0: i32) -> (i32, i32) {
    %c0_i32 = arith.constant 0 : i32
    %c0_i32_0 = arith.constant 0 : i32
    %c0_i32_1 = arith.constant 0 : i32
    return %c0_i32, %c0_i32_0 : i32, i32
  }
  func.func @transform_9(%arg0: i32) -> (i32, i32) {
    %c0_i32 = arith.constant 0 : i32
    %c0_i32_0 = arith.constant 0 : i32
    %c0_i32_1 = arith.constant 0 : i32
    return %c0_i32, %c0_i32_0 : i32, i32
  }
  func.func @transform_10(%arg0: i32) -> (i32, i32) {
    %c0_i32 = arith.constant 0 : i32
    %c0_i32_0 = arith.constant 0 : i32
    %c0_i32_1 = arith.constant 0 : i32
    return %c0_i32, %c0_i32_0 : i32, i32
  }
  func.func @transform_11(%arg0: i32) -> (i32, i32) {
    %c0_i32 = arith.constant 0 : i32
    %c0_i32_0 = arith.constant 0 : i32
    %c0_i32_1 = arith.constant 0 : i32
    return %c0_i32, %c0_i32_0 : i32, i32
  }
  func.func @transform_12(%arg0: i32) -> (i32, i32) {
    %c0_i32 = arith.constant 0 : i32
    %c0_i32_0 = arith.constant 0 : i32
    %c0_i32_1 = arith.constant 0 : i32
    return %c0_i32, %c0_i32_0 : i32, i32
  }
  func.func @transform_13(%arg0: i32) -> (i32, i32) {
    %c0_i32 = arith.constant 0 : i32
    %c0_i32_0 = arith.constant 0 : i32
    %c0_i32_1 = arith.constant 0 : i32
    return %c0_i32, %c0_i32_0 : i32, i32
  }
  func.func @transform_14(%arg0: i32) -> (i32, i32) {
    %c0_i32 = arith.constant 0 : i32
    %c0_i32_0 = arith.constant 0 : i32
    %c0_i32_1 = arith.constant 0 : i32
    return %c0_i32, %c0_i32_0 : i32, i32
  }
  func.func @transform_15(%arg0: i32) -> (i32, i32) {
    %c0_i32 = arith.constant 0 : i32
    %c0_i32_0 = arith.constant 0 : i32
    %c0_i32_1 = arith.constant 0 : i32
    return %c0_i32, %c0_i32_0 : i32, i32
  }
  func.func @transform_16(%arg0: i32) -> (i32, i32) {
    %c0_i32 = arith.constant 0 : i32
    %c0_i32_0 = arith.constant 0 : i32
    %c0_i32_1 = arith.constant 0 : i32
    return %c0_i32, %c0_i32_0 : i32, i32
  }
  func.func @transform_17(%arg0: i32) -> (i32, i32) {
    %c0_i32 = arith.constant 0 : i32
    %c0_i32_0 = arith.constant 0 : i32
    %c0_i32_1 = arith.constant 0 : i32
    return %c0_i32, %c0_i32_0 : i32, i32
  }
  func.func @transform_18(%arg0: i32) -> (i32, i32) {
    %c0_i32 = arith.constant 0 : i32
    %c0_i32_0 = arith.constant 0 : i32
    %c0_i32_1 = arith.constant 0 : i32
    return %c0_i32, %c0_i32_0 : i32, i32
  }
  func.func @transform_19(%arg0: i32) -> (i32, i32) {
    %c0_i32 = arith.constant 0 : i32
    %c0_i32_0 = arith.constant 0 : i32
    %c0_i32_1 = arith.constant 0 : i32
    return %c0_i32, %c0_i32_0 : i32, i32
  }
  func.func @transform_20(%arg0: i32) -> (i32, i32, i32) {
    %c0_i32 = arith.constant 0 : i32
    %c0_i32_0 = arith.constant 0 : i32
    %c0_i32_1 = arith.constant 0 : i32
    return %arg0, %c0_i32, %c0_i32_0 : i32, i32, i32
  }
}

</mosaic_0001>

<bundles_post_ra>
// kernel: tpu_custom_call.1
= control target key start
LH: loop header
LB: loop body
LE: loop exit
PB: predicated region body
PF: predicated region fallthrough
CT: control target
= control target key end

     0   :  { %s4171_s0 = inlined_call_operand.hbm [shape: f32[2,8,32], index: 0, kind: input, shape index: {}]   ;;  %s4172_s1 = inlined_call_operand.hbm [shape: f32[2,8,32], index: 1, kind: input, shape index: {}]   ;;  %s4173_s2 = inlined_call_operand.hbm [shape: f32[2,8,8], index: 2, kind: input, shape index: {}]   ;;  %s4174_s3 = inlined_call_operand.hbm [shape: f32[2,8,8], index: 3, kind: input, shape index: {}]   ;;  %s4175_s4 = inlined_call_operand.vmem [shape: f32[32,96], index: 4, kind: input, shape index: {}]   ;;  %s4176_s5 = inlined_call_operand.vmem [shape: f32[1,96], index: 5, kind: input, shape index: {}]   ;;  %s4177_s6 = inlined_call_operand.vmem [shape: f32[32,32], index: 6, kind: input, shape index: {}]   ;;  %s4178_s7 = inlined_call_operand.vmem [shape: f32[1,32], index: 7, kind: input, shape index: {}]   ;;  %s4179_s8 = inlined_call_operand.vmem [shape: f32[32,32], index: 8, kind: input, shape index: {}]   ;;  %s4180_s9 = inlined_call_operand.vmem [shape: f32[1,32], index: 9, kind: input, shape index: {}]   ;;  %s4181_s10 = inlined_call_operand.hbm [shape: f32[32,64], index: 10, kind: input, shape index: {}]   ;;  %s4182_s11 = inlined_call_operand.vmem [shape: f32[1,64], index: 11, kind: input, shape index: {}]   ;;  %s4183_s12 = inlined_call_operand.hbm [shape: f32[32,32], index: 12, kind: input, shape index: {}]   ;;  %s4184_s13 = inlined_call_operand.vmem [shape: f32[1,32], index: 13, kind: input, shape index: {}]   ;;  %s4185_s14 = inlined_call_operand.hbm [shape: f32[32,64], index: 14, kind: input, shape index: {}]   ;;  %s4186_s15 = inlined_call_operand.vmem [shape: f32[1,64], index: 15, kind: input, shape index: {}]   ;;  %s4187_s16 = inlined_call_operand.vmem [shape: f32[64,32], index: 16, kind: input, shape index: {}]   ;;  %s4188_s17 = inlined_call_operand.vmem [shape: f32[1,32], index: 17, kind: input, shape index: {}]   ;;  %s4189_s18 = inlined_call_operand.vmem [shape: f32[3,32], index: 18, kind: input, shape index: {}]   ;;  %s4190_s19 = inlined_call_operand.vmem [shape: f32[3,32], index: 19, kind: input, shape index: {}]   ;;  %s4191_s20 = inlined_call_operand.hbm [shape: f32[2,8,32], index: 20, kind: output, shape index: {}]  }
   0x1   :  { %4219 = sst [smem:[#allocation26_spill]] %s4171_s0 }
   0x2   :  { %4220 = sst [smem:[#allocation27_spill]] %s4172_s1 }
   0x3   :  { %4221 = sst [smem:[#allocation28_spill]] %s4173_s2 }
   0x4   :  { %4222 = sst [smem:[#allocation29_spill]] %s4174_s3 }
   0x5   :  { %4223 = sst [smem:[#allocation30_spill]] %s4175_s4 }
   0x6   :  { %4224 = sst [smem:[#allocation31_spill]] %s4180_s9 }
   0x7   :  { %4225 = sst [smem:[#allocation32_spill]] %s4181_s10 }
   0x8   :  { %4226 = sst [smem:[#allocation33_spill]] %s4182_s11 }
   0x9   :  { %4227 = sst [smem:[#allocation34_spill]] %s4183_s12 }
   0xa   :  { %4228 = sst [smem:[#allocation35_spill]] %s4184_s13 }
   0xb   :  { %4229 = sst [smem:[#allocation36_spill]] %s4185_s14 }
   0xc   :  { %4230 = sst [smem:[#allocation37_spill]] %s4186_s15 }
   0xd   :  { %4231 = sst [smem:[#allocation38_spill]] %s4187_s16 }
   0xe   :  { %4232 = sst [smem:[#allocation39_spill]] %s4188_s17 }
   0xf   :  { %4233 = sst [smem:[#allocation40_spill]] %s4190_s19 }
  0x10   :  { %4234 = sst [smem:[#allocation41_spill]] %s4191_s20 }
  0x11   :  { %25 = vsyncpa [#allocation3], 0 }
  0x12   :  { %27 = vsyncpa [#allocation3 + $0x1], 0 }
  0x13   :  { %28 = vsyncpa [#allocation6], 0 }
  0x14   :  { %30 = vsyncpa [#allocation6 + $0x1], 0 }
  0x15   :  { %31 = vsyncpa [#allocation9], 0 }
  0x16   :  { %33 = vsyncpa [#allocation9 + $0x1], 0 }
  0x17   :  { %34 = vsyncpa [#allocation12], 0 }
  0x18   :  { %35 = vsyncpa [#allocation4], 0 }
  0x19   :  { %37 = vsyncpa [#allocation4 + $0x1], 0  ;;  %s3530_s1 = smov 0   ;;  %s3532_s22 = smov 0  }
  0x1a   :  { %s3534_s23 = smov 0   ;;  %s3536_s24 = smov 0  }
  0x1b LB: > { %4235 = sst [smem:[#allocation21_spill]] %s3388_s1  ;;  %s3551_s2 = sadd.s32 4294967295, %s3400_s24   ;;  %s3400_s24 = sphi %s3536_s24, %s4282_s24   ;;  %s3396_s23 = sphi %s3534_s23, %s4286_s23   ;;  %s3392_s22 = sphi %s3532_s22, %s4285_s22   ;;  %s3388_s1 = sphi %s3530_s1, %s4284_s1  }
  0x1c   : > { %s2663_s25 = sadd.s32 4294967294, %s3400_s24   ;;  %p63_p0 = scmp.ne.s32.totalorder %s3392_s22, %s3388_s1 }
  0x1d   : > { %p4208_p1 = scmp.eq.s32.totalorder %s3551_s2, 0  ;;  %p501_p2 = scmp.eq.s32.totalorder %s3551_s2, 1 }
  0x1e   : > { %p507_p3 = scmp.eq.s32.totalorder %s2663_s25, 1  ;;  %p2664_p5 = scmp.ge.s32.totalorder %s3400_s24, 1 }
  0x1f   : > { %p3560_p4 = por %p4208_p1, %p63_p0  ;;  %p514_p7 = scmp.lt.s32.totalorder %s3400_s24, 3 }
  0x20   : > { %p3565_p6 = por %p507_p3, %p63_p0  ;;  %s3402_s28 = smov [#allocation10]  }
  0x21   : > { %s4236_s3 = scalar_select %p3560_p4, 1, 0 }
  0x22   : > { %s4237_s26 = scalar_select %p3565_p6, 1, 0 }
  0x23   : > { %p3570_p8 = pnand %p2664_p5, %p514_p7  ;;  %s544_s4 = sshll.u32 %s3402_s28, 4  ;;  %s545_s4 = int_to_ptr.vmem [resolvable:$true] %s544_s4 }
  0x24   : > { %4238 = sst [smem:[#allocation22_spill]] %s4237_s26  ;;  %s3403_s30 = smov [#allocation11]  }
  0x25   : > { %s4239_s27 = scalar_select %p3570_p8, 1, 0 }
  0x26   : > { %p3007_p9 = pneg %p3570_p8  ;;  %s560_s0 = sshll.u32 %s3403_s30, 4  ;;  %s561_s0 = int_to_ptr.vmem [resolvable:$true] %s560_s0 }
  0x27   : > { %s3141_s21 = scalar_lea.vmem %s545_s4, 512  ;;  %p3149_p5 = scmp.lt.s32.totalorder %s545_s4, %s545_s4 }
  0x28   : > { %p3579_p11 = pnand %p3007_p9, %p4208_p1  ;;  %p3142_p13 = scmp.ne.s32.totalorder %s545_s4, %s3141_s21 }
  0x29   : > { %p3150_p7 = scmp.lt.s32.totalorder %s3141_s21, %s3141_s21 }
  0x2a   : > { %s4240_s29 = scalar_select %p3579_p11, 1, 0 }
  0x2b   : > { %p4209_p12 = pneg %p3579_p11  ;;  %p3151_p10 = por %p3150_p7, %p3149_p5 }
  0x2d   : > { %p3144_p0 = pnand %p3142_p13, %p4209_p12 }
  0x2f   : > { %p3145_p3 = pneg %p3144_p0 }
  0x31   : > { %p3152_p9 = pnand %p3151_p10, %p3145_p3 }
  0x33   : > { %3155 = shalt.err (!%p3152_p9)
}
  0x34   : > { %s4200_s25 = smov 128   ;;  %s4201_s28 = smov 8  }
  0x35   : > { %s4241_s10 = sld [smem:[#allocation32_spill]]  ;;  %s3167_s1 = scalar_lea.vmem %s561_s0, 512 }
  0x36   : > { %p3168_p13 = scmp.ne.s32.totalorder %s561_s0, %s3167_s1  ;;  %p3175_p10 = scmp.lt.s32.totalorder %s561_s0, %s561_s0 }
  0x37   : > { %p3176_p3 = scmp.lt.s32.totalorder %s3167_s1, %s3167_s1 }
  0x38   : > { %p3170_p0 = pnand %p3168_p13, %p4209_p12 }
  0x39   : > { %p3177_p7 = por %p3176_p3, %p3175_p10 }
  0x3a   : > { %p3171_p5 = pneg %p3170_p0 }
  0x3b   : > { %3010 = dma.hbm_to_vmem [thread:$0]  (!%p3579_p11), %s4241_s10, 512, %s545_s4, [#allocation9], %s4200_s25, %s4200_s25, %s4201_s28  }
  0x3c   : > { %p3178_p9 = pnand %p3177_p7, %p3171_p5 }
  0x3e   : > { %3181 = shalt.err (!%p3178_p9)
}
  0x3f   : > { %s4242_s12 = sld [smem:[#allocation34_spill]]  ;;  %s3608_s1 = sadd.s32 1, %s3400_s24  }
  0x40   : > { %4243 = sst [smem:[#allocation23_spill]] %s3608_s1  ;;  %s50_s26 = sadd.s32 1, %s3396_s23 }
  0x41   : > { %s47_s4 = ssub.s32 %s3400_s24, %s3608_s1  ;;  %p57_p13 = scmp.ne.s32.totalorder %s3396_s23, %s3392_s22 }
  0x42   : > { %p48_p0 = scmp.eq.s32.totalorder %s47_s4, 0  ;;  %p58_p5 = scmp.eq.s32.totalorder %s3400_s24, 0 }
  0x43   : > { %p3618_p10 = por %p501_p2, %p57_p13  ;;  %p3037_p3 = scmp.lt.s32.totalorder %s3400_s24, 2 }
  0x44   : > { %s3624_s30 = scalar_select %p48_p0, %s3396_s23, %s50_s26  }
  0x45   : > { %3013 = dma.hbm_to_vmem [thread:$0]  (!%p3579_p11), %s4242_s12, 512, %s561_s0, [#allocation12], %s4200_s25, %s4200_s25, %s4201_s28  }
  0x46   : > { %s4244_s20 = scalar_select %p3618_p10, 1, 0 }
  0x47   : > { %4246 = sst [smem:[#allocation25_spill]] %s3624_s30  ;;  %p59_p7 = por %p58_p5, %p57_p13 }
  0x48   : > { %4245 = sst [smem:[#allocation24_spill]] %s4244_s20  ;;  %s4206_s21 = sand.u32 1, %s3396_s23  }
  0x49   : > { %s3629_s0 = sshll.u32 %s4206_s21, 3  ;;  %s3632_s25 = sshll.u32 %s3400_s24, 7 }
  0x4a   : > { %p3634_p9 = pnand %p3037_p3, %p59_p7  ;;  %s4210_s28 = sand.u32 1, %s3400_s24  }
  0x4b   : > { %s4248_s1 = sld [smem:[#allocation27_spill]]  ;;  %s627_s21 = scalar_lea.vmem [#allocation5], %s3629_s0 }
  0x4c   : > { %s634_s30 = sshll.u32 %s627_s21, 4  ;;  %s3648_s17 = scalar_lea.sflag [#allocation6], %s4210_s28  ;;  %s635_s30 = int_to_ptr.vmem [resolvable:$true] %s634_s30 }
  0x4d   : > { %p3654_p13 = pneg %p3634_p9 }
  0x51   : > { %s4249_s20 = smov %s4248_s1  ;;  %s3643_s26 = scalar_lea.hbm %s4248_s1, %s3632_s25 }
  0x52   : > { %s3182_s15 = scalar_lea.hbm %s3643_s26, 128  ;;  %s3187_s1 = scalar_lea.hbm %s4249_s20, 256 }
  0x53   : > { %p3183_p2 = scmp.ne.s32.totalorder %s3643_s26, %s3182_s15  ;;  %p3188_p3 = scmp.lt.s32.totalorder %s3643_s26, %s4249_s20 }
  0x54   : > { %p3189_p7 = scmp.lt.s32.totalorder %s3187_s1, %s3182_s15 }
  0x55   : > { %p3185_p0 = pnand %p3654_p13, %p3183_p2 }
  0x56   : > { %p3190_p1 = por %p3189_p7, %p3188_p3 }
  0x57   : > { %p3186_p5 = pneg %p3185_p0 }
  0x59   : > { %p3191_p12 = pnand %p3190_p1, %p3186_p5 }
  0x5b   : > { %3194 = shalt.err (!%p3191_p12)
}
  0x5c   : > { %s3195_s28 = scalar_lea.vmem %s635_s30, 128  ;;  %s3406_s9 = smov [#allocation5]  }
  0x5d   : > { %p3196_p6 = scmp.ne.s32.totalorder %s635_s30, %s3195_s28  ;;  %s3200_s11 = sshll.u32 %s3406_s9, 4  ;;  %s3201_s11 = int_to_ptr.vmem [resolvable:$false] %s3200_s11 }
  0x5e   : > { %s3202_s19 = scalar_lea.vmem %s3201_s11, 256  ;;  %p3203_p2 = scmp.lt.s32.totalorder %s635_s30, %s3201_s11 }
  0x5f   : > { %p3198_p10 = pnand %p3196_p6, %p3654_p13  ;;  %p3204_p0 = scmp.lt.s32.totalorder %s3202_s19, %s3195_s28 }
  0x61   : > { %p3199_p4 = pneg %p3198_p10  ;;  %p3205_p8 = por %p3204_p0, %p3203_p2 }
  0x63   : > { %p3206_p11 = pnand %p3205_p8, %p3199_p4 }
  0x65   : > { %3209 = shalt.err (!%p3206_p11)
}
  0x66   : > { %3023 = dma.hbm_to_vmem [thread:$0]  (!%p3634_p9), %s3643_s26, 128, %s635_s30, %s3648_s17  }
  0x67   : > { %s3407_s13 = smov [#allocation13]   ;;  %p4251_p6 = scmp.ne.s32.totalorder %s4240_s29, 0 }
  0x68   : > { %s576_s15 = sshll.u32 %s3407_s13, 4  ;;  %s577_s15 = int_to_ptr.vmem [resolvable:$true] %s576_s15 }
  0x69   : > { %s3221_s10 = scalar_lea.vmem %s577_s15, 512  ;;  %p4252_p12 = pneg %p4251_p6 }
  0x6a   : > { %p3222_p1 = scmp.ne.s32.totalorder %s577_s15, %s3221_s10  ;;  %p3229_p3 = scmp.lt.s32.totalorder %s577_s15, %s577_s15 }
  0x6b   : > { %p3230_p7 = scmp.lt.s32.totalorder %s3221_s10, %s3221_s10 }
  0x6c   : > { %p3224_p10 = pnand %p3222_p1, %p4252_p12 }
  0x6d   : > { %p3231_p2 = por %p3230_p7, %p3229_p3 }
  0x6e   : > { %p3225_p5 = pneg %p3224_p10 }
  0x70   : > { %p3232_p4 = pnand %p3231_p2, %p3225_p5 }
  0x72   : > { %3235 = shalt.err (!%p3232_p4)
}
  0x73   : > { %s4253_s9 = smov 8   ;;  %s4254_s11 = smov 128  }
  0x74   : > { %s4255_s14 = sld [smem:[#allocation36_spill]]  ;;  %s609_s29 = scalar_lea.vmem [#allocation2], %s3629_s0 }
  0x75   : > { %s4256_s12 = sld [smem:[#allocation26_spill]]  ;;  %s616_s21 = sshll.u32 %s609_s29, 4  ;;  %s617_s21 = int_to_ptr.vmem [resolvable:$true] %s616_s21 }
  0x76   : > { %s4257_s13 = sand.u32 1, %s3396_s23  }
  0x77   : > { %s606_s10 = scalar_lea.sflag [#allocation3], %s4257_s13 }
  0x7a   : > { %3016 = dma.hbm_to_vmem [thread:$0]  (!%p4251_p6), %s4255_s14, 512, %s577_s15, [#allocation12], %s4254_s11, %s4254_s11, %s4253_s9  }
  0x7b   : > { %s3688_s1 = scalar_lea.hbm %s4256_s12, %s3632_s25  ;;  %s3241_s9 = scalar_lea.hbm %s4256_s12, 256 }
  0x7c   : > { %s3236_s20 = scalar_lea.hbm %s3688_s1, 128  ;;  %p3242_p1 = scmp.lt.s32.totalorder %s3688_s1, %s4256_s12 }
  0x7d   : > { %p3237_p8 = scmp.ne.s32.totalorder %s3688_s1, %s3236_s20  ;;  %p3243_p6 = scmp.lt.s32.totalorder %s3241_s9, %s3236_s20 }
  0x7f   : > { %p3239_p11 = pnand %p3237_p8, %p3654_p13  ;;  %p3244_p12 = por %p3243_p6, %p3242_p1 }
  0x81   : > { %p3240_p0 = pneg %p3239_p11 }
  0x83   : > { %p3245_p10 = pnand %p3244_p12, %p3240_p0 }
  0x85   : > { %3248 = shalt.err (!%p3245_p10)
}
  0x86   : > { %s3249_s30 = scalar_lea.vmem %s617_s21, 128  ;;  %s3408_s26 = smov [#allocation2]  }
  0x87   : > { %p3250_p5 = scmp.ne.s32.totalorder %s617_s21, %s3249_s30  ;;  %s3254_s29 = sshll.u32 %s3408_s26, 4  ;;  %s3255_s29 = int_to_ptr.vmem [resolvable:$false] %s3254_s29 }
  0x88   : > { %s3256_s13 = scalar_lea.vmem %s3255_s29, 256  ;;  %p3257_p2 = scmp.lt.s32.totalorder %s617_s21, %s3255_s29 }
  0x89   : > { %p3252_p3 = pnand %p3250_p5, %p3654_p13  ;;  %p3258_p4 = scmp.lt.s32.totalorder %s3256_s13, %s3249_s30 }
  0x8b   : > { %p3253_p7 = pneg %p3252_p3  ;;  %p3259_p8 = por %p3258_p4, %p3257_p2 }
  0x8d   : > { %p3260_p11 = pnand %p3259_p8, %p3253_p7 }
  0x8f   : > { %3263 = shalt.err (!%p3260_p11)
}
  0x90   : > { %3020 = dma.hbm_to_vmem [thread:$0]  (!%p3634_p9), %s3688_s1, 128, %s617_s21, %s606_s10  }
  0x91   : > { %s4258_s15 = sld [smem:[#allocation28_spill]]  ;;  %s645_s11 = scalar_lea.vmem [#allocation7], %s3629_s0 }
  0x92   : > { %s652_s28 = sshll.u32 %s645_s11, 4  ;;  %s653_s28 = int_to_ptr.vmem [resolvable:$true] %s652_s28 }
  0x97   : > { %s650_s9 = scalar_lea.hbm %s4258_s15, %s3632_s25  ;;  %s3269_s13 = scalar_lea.hbm %s4258_s15, 256 }
  0x98   : > { %s3264_s26 = scalar_lea.hbm %s650_s9, 128  ;;  %p3270_p12 = scmp.lt.s32.totalorder %s650_s9, %s4258_s15 }
  0x99   : > { %p3265_p0 = scmp.ne.s32.totalorder %s650_s9, %s3264_s26  ;;  %p3271_p10 = scmp.lt.s32.totalorder %s3269_s13, %s3264_s26 }
  0x9b   : > { %p3267_p1 = pnand %p3265_p0, %p3654_p13  ;;  %p3272_p5 = por %p3271_p10, %p3270_p12 }
  0x9d   : > { %p3268_p6 = pneg %p3267_p1 }
  0x9f   : > { %p3273_p3 = pnand %p3272_p5, %p3268_p6 }
  0xa1   : > { %3276 = shalt.err (!%p3273_p3)
}
  0xa2   : > { %s3277_s1 = scalar_lea.vmem %s653_s28, 128  ;;  %s3409_s21 = smov [#allocation7]  }
  0xa3   : > { %p3278_p7 = scmp.ne.s32.totalorder %s653_s28, %s3277_s1  ;;  %s3282_s10 = sshll.u32 %s3409_s21, 4  ;;  %s3283_s10 = int_to_ptr.vmem [resolvable:$false] %s3282_s10 }
  0xa4   : > { %s3284_s20 = scalar_lea.vmem %s3283_s10, 256  ;;  %p3285_p8 = scmp.lt.s32.totalorder %s653_s28, %s3283_s10 }
  0xa5   : > { %p3280_p2 = pnand %p3278_p7, %p3654_p13  ;;  %p3286_p11 = scmp.lt.s32.totalorder %s3284_s20, %s3277_s1 }
  0xa7   : > { %p3281_p4 = pneg %p3280_p2  ;;  %p3287_p0 = por %p3286_p11, %p3285_p8 }
  0xa9   : > { %p3288_p1 = pnand %p3287_p0, %p3281_p4 }
  0xab   : > { %3291 = shalt.err (!%p3288_p1)
}
  0xac   : > { %3026 = dma.hbm_to_vmem [thread:$0]  (!%p3634_p9), %s650_s9, 128, %s653_s28, %s3648_s17  }
  0xad   : > { %s4259_s19 = sld [smem:[#allocation29_spill]]  ;;  %s663_s26 = scalar_lea.vmem [#allocation8], %s3629_s0 }
  0xae   : > { %s670_s30 = sshll.u32 %s663_s26, 4  ;;  %s4260_s29 = sand.u32 1, %s3400_s24   ;;  %s671_s30 = int_to_ptr.vmem [resolvable:$true] %s670_s30 }
  0xaf   : > { %s660_s13 = scalar_lea.sflag [#allocation9], %s4260_s29 }
  0xb3   : > { %s3731_s11 = scalar_lea.hbm %s4259_s19, %s3632_s25  ;;  %s3297_s9 = scalar_lea.hbm %s4259_s19, 256 }
  0xb4   : > { %s3292_s1 = scalar_lea.hbm %s3731_s11, 128  ;;  %p3298_p5 = scmp.lt.s32.totalorder %s3731_s11, %s4259_s19 }
  0xb5   : > { %p3293_p6 = scmp.ne.s32.totalorder %s3731_s11, %s3292_s1  ;;  %p3299_p3 = scmp.lt.s32.totalorder %s3297_s9, %s3292_s1 }
  0xb7   : > { %p3295_p12 = pnand %p3293_p6, %p3654_p13  ;;  %p3300_p7 = por %p3299_p3, %p3298_p5 }
  0xb9   : > { %p3296_p10 = pneg %p3295_p12 }
  0xbb   : > { %p3301_p2 = pnand %p3300_p7, %p3296_p10 }
  0xbd   : > { %3304 = shalt.err (!%p3301_p2)
}
  0xbe   : > { %s3305_s0 = scalar_lea.vmem %s671_s30, 128  ;;  %s3410_s10 = smov [#allocation8]  }
  0xbf   : > { %p3306_p4 = scmp.ne.s32.totalorder %s671_s30, %s3305_s0  ;;  %s3310_s20 = sshll.u32 %s3410_s10, 4  ;;  %s3311_s20 = int_to_ptr.vmem [resolvable:$false] %s3310_s20 }
  0xc0   : > { %s3312_s14 = scalar_lea.vmem %s3311_s20, 256  ;;  %p3313_p0 = scmp.lt.s32.totalorder %s671_s30, %s3311_s20 }
  0xc1   : > { %p3308_p8 = pnand %p3306_p4, %p3654_p13  ;;  %p3314_p1 = scmp.lt.s32.totalorder %s3312_s14, %s3305_s0 }
  0xc3   : > { %p3309_p11 = pneg %p3308_p8  ;;  %p3315_p6 = por %p3314_p1, %p3313_p0 }
  0xc5   : > { %p3316_p12 = pnand %p3315_p6, %p3309_p11 }
  0xc7   : > { %3319 = shalt.err (!%p3316_p12)
}
  0xc8   : > { %3029 = dma.hbm_to_vmem [thread:$0]  (!%p3634_p9), %s3731_s11, 128, %s671_s30, %s660_s13  }
  0xc9   : > { %p4261_p10 = scmp.ne.s32.totalorder %s4239_s27, 0 }
  0xca   : > { %s3755_s16 = sand.u32 (!%p4261_p10), 1, %s3392_s22   ;;  %p4262_p13 = scmp.ne.s32.totalorder (!%p4261_p10), %s4236_s3, 0 }
  0xcb   : > { %679 = sbr.rel (%p4261_p10) target bundleno = 6491 (0x195b), region = 100  ;;  %s3758_s12 = sshll.u32 (!%p4261_p10), %s3755_s16, 3 }
  0xcc   : > { %s682_s26 = scalar_lea.sflag (!%p4261_p10), [#allocation3], %s3755_s16  ;;  %s685_s29 = scalar_lea.vmem (!%p4261_p10), [#allocation2], %s3758_s12 }
  0xd0   : > { %3363 = dma.done.wait (%p4262_p13), %s682_s26, 128  }
  0xd1   : > { %3365 = vsyncadd (%p4262_p13), %s682_s26, 4294967168  ;;  %s690_s27 = sand.u32 1, %s3551_s2   ;;  %s694_s11 = scalar_lea.vmem [#allocation5], %s3758_s12 }
  0xd2   : > { %s691_s4 = scalar_lea.sflag [#allocation6], %s690_s27 }
  0xd3   : > { %3367 = dma.done.wait (%p4262_p13), %s691_s4, 256  }
  0xd4   : > { %3369 = vsyncadd (%p4262_p13), %s691_s4, 4294967040  ;;  %s703_s30 = scalar_lea.vmem [#allocation7], %s3758_s12  ;;  %s709_s13 = scalar_lea.sflag [#allocation9], %s690_s27 }
  0xd5   : > { %s712_s1 = scalar_lea.vmem [#allocation8], %s3758_s12 }
  0xd6   : > { %3371 = dma.done.wait (%p4262_p13), %s709_s13, 128  }
  0xd7   : > { %3373 = vsyncadd (%p4262_p13), %s709_s13, 4294967168  ;;  %p4263_p9 = scmp.eq.s32.totalorder %s3551_s2, 0 }
  0xd9   : > { %3375 = dma.done.wait (%p4263_p9), [#allocation9], 512   ;;  %p4264_p5 = pmov %p4263_p9 }
  0xdb   : > { %3377 = vsyncadd (%p4264_p5), [#allocation9], 4294966784  ;;  %p4265_p3 = pmov %p4264_p5 }
  0xdd   : > { %3379 = dma.done.wait (%p4265_p3), [#allocation12], 1024   ;;  %p4266_p7 = pmov %p4265_p3 }
  0xde   : > { %v3411_v0 = vmov 0.0   ;;  %vm3412_vm0 = vmmov 0   ;;  %s4267_s17 = sld [smem:[#allocation30_spill]]  ;;  %v3804_v7 = vld [vmem:[%s685_s29] sm:$0xff]  ;;  %vm813_vm1 = vcmask 261120   ;;  %s3413_s29 = smov 120  }
  0xdf   : > { %3381 = vsyncadd (%p4266_p7), [#allocation12], 4294966272  ;;  %2797 = vmatprep.subr.bf16.mxu1 %v3411_v0  ;;  %2801 = vmatprep.mubr.msk.bf16.mxu1 %vm3412_vm0, %v3411_v0  ;;  %v803_v8 = vpack.c.bf16 %v3804_v7, %v3804_v7  ;;  %v2686_v9 = vld [vmem:[%s4176_s5] ss:$0 sm:$0xff]  ;;  %s3414_s27 = smov 96   ;;  %s3415_s4 = smov 88  }
  0xe0   : > { %2811 = vmatprep.subr.bf16.mxu0 %v3411_v0  ;;  %2813 = vmatprep.mubr.msk.bf16.mxu0 %vm3412_vm0, %v3411_v0  ;;  %vm862_vm2 = vcmask 64512   ;;  %v3837_v22 = vld [vmem:[%s703_s30] sm:$0xff]  ;;  %s3416_s30 = smov 64   ;;  %s3417_s13 = smov 56   ;;  %vm928_vm3 = vcmask 1043456   ;;  %vm2414_vm4 = vcmask 523264  }
  0xe1   : > { %s3418_s3 = smov 112   ;;  %s3419_s21 = smov 80   ;;  %v972_v58 = vld [vmem:[%s4177_s6] sm:$0xff]  ;;  %v1087_v61 = vld [vmem:[%s4177_s6 + $0x8] sm:$0xff] }
  0xe2   : > { %v974_v59 = vpack.c.bf16 %v972_v58, %v972_v58  ;;  %v1089_v62 = vpack.c.bf16 %v1087_v61, %v1087_v61  ;;  %s3420_s10 = smov 72   ;;  %s3421_s20 = smov 104  }
  0xe3   : > { %s3422_s14 = smov 48   ;;  %s4273_s28 = sld [smem:[#allocation37_spill]] }
  0xe4   : > { %v801_v1 = vld [vmem:[%s4267_s17 + $0x10] sm:$0xff]  ;;  %v802_v2 = vld [vmem:[%s4267_s17 + $0x18] sm:$0xff]  ;;  %v799_v3 = vld [vmem:[%s4267_s17] sm:$0xff]  ;;  %v1140_v60 = vsel %vm928_vm3, %v974_v59, 0  ;;  %v1094_v63 = vsel %vm928_vm3, %v1089_v62, 0  ;;  %s4274_s0 = sld [smem:[#allocation39_spill]] }
  0xe5   : > { %v805_v4 = vpack.c.bf16 %v802_v2, %v801_v1  ;;  %v800_v5 = vld [vmem:[%s4267_s17 + $0x8] sm:$0xff]  ;;  %s4276_s9 = sld [smem:[#allocation41_spill]] }
  0xe6   : > { %v804_v6 = vpack.c.bf16 %v800_v5, %v799_v3 }
  0xe7   : > { %2798 = vmatpush3.bf16.msra.mxu1 %v805_v4 }
  0xe8   : > { %2799 = vmatprep.subr.bf16.mxu1 %v3411_v0 }
  0xeb   : > { %2800 = vmatpush3.bf16.msra.mxu1 %v804_v6 }
  0xec   : > { %2805 = vmatprep.subr.bf16.mxu1 %v3411_v0 }
  0xee   : > { %2802 = vmatmul.mubr.msk.bf16.vlgmr.msra.gmra.mxu1 %vm813_vm1, %v803_v8 }
  0xef   : > { %2807 = vmatprep.mubr.msk.bf16.mxu1 %vm3412_vm0, %v3411_v0 }
 0x1ae   : > { %v851_v10 = vpop.f32.mrf.mxu1 }
 0x1af   : > { %v852_v11 = vadd.f32 %v2686_v9, %v851_v10 }
 0x1b0   : > { %v2803_v12 = vpop.f32.mrf.mxu1 }
 0x1b1   : > { %v3816_v13 = vpack.c.bf16 %v852_v11, %v852_v11 }
 0x1b2   : > { %v854_v14 = vpop.f32.mrf.mxu1 }
 0x1b3   : > { %975 = vrot.lane.b32.xlu1 %v3816_v13, %s3413_s29  ;;  %860 = vrot.lane.b32.xlu0 %v3816_v13, %s3414_s27 }
 0x1b4   : > { %v2804_v15 = vpop.f32.mrf.mxu1 }
 0x1b7   : > { %977 = vrot.lane.b32.xlu0 %v3816_v13, %s3415_s4 }
 0x225   : > { %v861_v16 = vpop.permute.xlu0 %860  ;;  %v976_v20 = vpop.permute.xlu1 %975 }
 0x226   : > { %v867_v17 = vsel %vm862_vm2, %v861_v16, 0 }
 0x227   : > { %2806 = vmatpush3.bf16.xpose.msra.mxu1 %v867_v17 }
 0x228   : > { %2817 = vmatprep.subr.bf16.mxu1 %v3411_v0 }
 0x229   : > { %v978_v18 = vpop.permute.xlu0 %977 }
 0x22a   : > { %v983_v19 = vsel %vm862_vm2, %v978_v18, 0 }
 0x22e   : > { %2808 = vmatmul.mubr.msk.bf16.vlgmr.msra.gmra.mxu1 %vm862_vm2, %v3816_v13 }
 0x22f   : > { %2818 = vmatpush3.bf16.xpose.msra.mxu1 %v983_v19  ;;  %2819 = vmatprep.mubr.msk.bf16.mxu1 %vm3412_vm0, %v3411_v0 }
 0x230   : > { %2829 = vmatprep.subr.bf16.mxu1 %v3411_v0 }
 0x236   : > { %2820 = vmatmul.mubr.msk.bf16.vlgmr.msra.gmra.mxu1 %vm862_vm2, %v976_v20 }
 0x237   : > { %2831 = vmatprep.mubr.msk.bf16.mxu1 %vm3412_vm0, %v3411_v0  ;;  %2830 = vmatpush3.bf16.msra.mxu1 %v1094_v63 }
 0x238   : > { %2841 = vmatprep.subr.bf16.mxu1 %v3411_v0 }
 0x2ee   : > { %v903_v21 = vpop.f32.mrf.mxu1 }
 0x2ef   : > { %v909_v23 = vmul.f32 0.35355338, %v903_v21 }
 0x2f0   : > { %v2809_v24 = vpop.f32.mrf.mxu1 }
 0x2f1   : > { %v910_v25 = vadd.f32 %v909_v23, %v3837_v22 }
 0x2f2   : > { %v906_v26 = vpop.f32.mrf.mxu1 }
 0x2f3   : > { %v911_v27 = vsel %vm862_vm2, %v910_v25, -inf }
 0x2f4   : > { %912 = vmax.xlane.f32.xlu1 %v911_v27  ;;  %v2810_v28 = vpop.f32.mrf.mxu1 }
 0x2f6   : > { %v1019_v29 = vpop.f32.mrf.mxu1 }
 0x2f7   : > { %v1025_v30 = vmul.f32 0.35355338, %v1019_v29 }
 0x2f8   : > { %v2821_v31 = vpop.f32.mrf.mxu1 }
 0x2f9   : > { %v1026_v32 = vadd.f32 %v1025_v30, %v3837_v22 }
 0x2fa   : > { %v1022_v33 = vpop.f32.mrf.mxu1 }
 0x2fb   : > { %v1027_v34 = vsel %vm862_vm2, %v1026_v32, -inf }
 0x2fc   : > { %1028 = vmax.xlane.f32.xlu0 %v1027_v34  ;;  %v2822_v35 = vpop.f32.mrf.mxu1 }
 0x37d   : > { %v913_v36 = vpop.xlane.xlu1 %912 }
 0x37e   : > { %v914_v37 = vsub.f32 %v910_v25, %v913_v36 }
 0x380   : > { %v915_v38 = vmul.f32 1.442695, %v914_v37 }
 0x382   : > { %3092 = vpow2.f32 %v915_v38 }
 0x385   : > { %v1029_v39 = vpop.xlane.xlu0 %1028 }
 0x386   : > { %v1030_v40 = vsub.f32 %v1026_v32, %v1029_v39 }
 0x388   : > { %v1031_v41 = vmul.f32 1.442695, %v1030_v40 }
 0x38a   : > { %3094 = vpow2.f32 %v1031_v41 }
 0x38f   : > { %v3093_v42 = vpop.eup %3092 }
 0x390   : > { %v917_v43 = vsel %vm862_vm2, %v3093_v42, 0.0 }
 0x391   : > { %918 = vadd.xlane.f32.xlu0 %v917_v43 }
 0x397   : > { %v3095_v44 = vpop.eup %3094 }
 0x398   : > { %v1033_v45 = vsel %vm862_vm2, %v3095_v44, 0.0 }
 0x399   : > { %1034 = vadd.xlane.f32.xlu1 %v1033_v45 }
 0x3a7   : > { %923 = vrot.lane.b32.xlu0 %v3816_v13, %s3416_s30 }
 0x3aa   : > { %1039 = vrot.lane.b32.xlu1 %v3816_v13, %s3417_s13  ;;  %s3423_s13 = smov 40  }
 0x3ab   : > { %1182 = vrot.lane.b32.xlu0 %v3816_v13, %s3418_s3 }
 0x3ae   : > { %1184 = vrot.lane.b32.xlu1 %v3816_v13, %s3419_s21 }
 0x41a   : > { %v919_v46 = vpop.xlane.xlu0 %918 }
 0x41b   : > { %3096 = vrcp.f32 %v919_v46 }
 0x41e   : > { %v924_v47 = vpop.permute.xlu0 %923 }
 0x41f   : > { %v930_v48 = vsel %vm928_vm3, %v924_v47, 0  ;;  %v1294_v47 = vld [vmem:[%s4177_s6 + $0x10] sm:$0xff] }
 0x420   : > { %2812 = vmatpush3.bf16.msra.mxu0 %v930_v48  ;;  %v1296_v48 = vpack.c.bf16 %v1294_v47, %v1294_v47 }
 0x421   : > { %2823 = vmatprep.subr.bf16.mxu0 %v3411_v0 }
 0x422   : > { %v1035_v49 = vpop.xlane.xlu1 %1034  ;;  %v1183_v15 = vpop.permute.xlu0 %1182 }
 0x423   : > { %3098 = vrcp.f32 %v1035_v49  ;;  %v1301_v49 = vsel %vm928_vm3, %v1296_v48, 0  ;;  %v1541_v48 = vld [vmem:[%s4179_s8] sm:$0xff] }
 0x426   : > { %v1040_v52 = vpop.permute.xlu1 %1039 }
 0x427   : > { %v1045_v54 = vsel %vm928_vm3, %v1040_v52, 0 }
 0x428   : > { %v3097_v50 = vpop.eup %3096 }
 0x429   : > { %v921_v51 = vmul.f32 %v3097_v50, %v3093_v42 }
 0x42a   : > { %v1185_v6 = vpop.permute.xlu1 %1184 }
 0x42b   : > { %v922_v53 = vpack.c.bf16 %v921_v51, %v921_v51  ;;  %v1190_v11 = vsel %vm862_vm2, %v1185_v6, 0 }
 0x42d   : > { %2814 = vmatmul.mubr.msk.bf16.vlgmr.msra.gmra.mxu0 %vm862_vm2, %v922_v53 }
 0x42e   : > { %2824 = vmatpush3.bf16.msra.mxu0 %v1045_v54  ;;  %2825 = vmatprep.mubr.msk.bf16.mxu0 %vm3412_vm0, %v3411_v0 }
 0x42f   : > { %2835 = vmatprep.subr.bf16.mxu0 %v3411_v0 }
 0x430   : > { %v3099_v55 = vpop.eup %3098 }
 0x431   : > { %v1037_v56 = vmul.f32 %v3099_v55, %v3095_v44 }
 0x433   : > { %v1038_v57 = vpack.c.bf16 %v1037_v56, %v1037_v56 }
 0x435   : > { %2826 = vmatmul.mubr.msk.bf16.vlgmr.msra.gmra.mxu0 %vm862_vm2, %v1038_v57 }
 0x436   : > { %2837 = vmatprep.mubr.msk.bf16.mxu0 %vm3412_vm0, %v3411_v0  ;;  %2836 = vmatpush3.bf16.msra.mxu0 %v1140_v60 }
 0x437   : > { %2847 = vmatprep.subr.bf16.mxu0 %v3411_v0 }
 0x4ed   : > { %v966_v1 = vpop.f32.mrf.mxu0 }
 0x4ee   : > { %v973_v2 = vpack.c.bf16 %v966_v1, %v966_v1 }
 0x4ef   : > { %v2815_v3 = vpop.f32.mrf.mxu0 }
 0x4f0   : > { %2838 = vmatmul.mubr.msk.bf16.vlgmr.msra.gmra.mxu0 %vm862_vm2, %v973_v2 }
 0x4f1   : > { %v969_v4 = vpop.f32.mrf.mxu0  ;;  %2849 = vmatprep.mubr.msk.bf16.mxu0 %vm3412_vm0, %v3411_v0 }
 0x4f3   : > { %v2816_v5 = vpop.f32.mrf.mxu0 }
 0x4f5   : > { %v1081_v8 = vpop.f32.mrf.mxu0 }
 0x4f6   : > { %v1088_v9 = vpack.c.bf16 %v1081_v8, %v1081_v8 }
 0x4f7   : > { %v2827_v10 = vpop.f32.mrf.mxu0 }
 0x4f8   : > { %2832 = vmatmul.mubr.msk.bf16.vlgmr.msra.gmra.mxu1 %vm862_vm2, %v1088_v9 }
 0x4f9   : > { %2842 = vmatpush3.bf16.xpose.msra.mxu1 %v1190_v11  ;;  %v1084_v12 = vpop.f32.mrf.mxu0  ;;  %2843 = vmatprep.mubr.msk.bf16.mxu1 %vm3412_vm0, %v3411_v0 }
 0x4fa   : > { %2853 = vmatprep.subr.bf16.mxu1 %v3411_v0 }
 0x4fb   : > { %v2828_v14 = vpop.f32.mrf.mxu0 }
 0x500   : > { %2844 = vmatmul.mubr.msk.bf16.vlgmr.msra.gmra.mxu1 %vm862_vm2, %v1183_v15 }
 0x501   : > { %2855 = vmatprep.mubr.msk.bf16.mxu1 %vm3412_vm0, %v3411_v0  ;;  %2854 = vmatpush3.bf16.msra.mxu1 %v1301_v49  ;;  %v1542_v49 = vld [vmem:[%s4179_s8 + $0x8] sm:$0xff] }
 0x502   : > { %2865 = vmatprep.subr.bf16.mxu1 %v3411_v0 }
 0x5b0   : > { %v1176_v16 = vpop.f32.mrf.mxu0 }
 0x5b2   : > { %v2839_v17 = vpop.f32.mrf.mxu0 }
 0x5b4   : > { %v1179_v18 = vpop.f32.mrf.mxu0 }
 0x5b6   : > { %v2840_v19 = vpop.f32.mrf.mxu0 }
 0x5b8   : > { %v1130_v20 = vpop.f32.mrf.mxu1 }
 0x5b9   : > { %v3882_v21 = vadd.f32 %v1176_v16, %v1130_v20 }
 0x5ba   : > { %v2833_v23 = vpop.f32.mrf.mxu1 }
 0x5bc   : > { %v1133_v24 = vpop.f32.mrf.mxu1 }
 0x5be   : > { %v2834_v25 = vpop.f32.mrf.mxu1 }
 0x5bf   : > { %v2700_v25 = vld [vmem:[%s4178_s7] ss:$0 sm:$0xff] }
 0x5c0   : > { %v1226_v26 = vpop.f32.mrf.mxu1 }
 0x5c1   : > { %v1232_v27 = vmul.f32 0.35355338, %v1226_v26 }
 0x5c2   : > { %v2845_v28 = vpop.f32.mrf.mxu1 }
 0x5c3   : > { %v1233_v29 = vadd.f32 %v1232_v27, %v3837_v22 }
 0x5c4   : > { %v1229_v30 = vpop.f32.mrf.mxu1 }
 0x5c5   : > { %v1234_v31 = vsel %vm862_vm2, %v1233_v29, -inf }
 0x5c6   : > { %1235 = vmax.xlane.f32.xlu1 %v1234_v31  ;;  %v2846_v32 = vpop.f32.mrf.mxu1 }
 0x5d7   : > { %1346 = vrot.lane.b32.xlu1 %v3816_v13, %s3420_s10 }
 0x5db   : > { %1344 = vrot.lane.b32.xlu1 %v3816_v13, %s3421_s20 }
 0x64f   : > { %v1236_v33 = vpop.xlane.xlu1 %1235 }
 0x650   : > { %v1237_v34 = vsub.f32 %v1233_v29, %v1236_v33 }
 0x652   : > { %v1238_v35 = vmul.f32 1.442695, %v1237_v34 }
 0x653   : > { %v1347_v43 = vpop.permute.xlu1 %1346 }
 0x654   : > { %3100 = vpow2.f32 %v1238_v35  ;;  %v1352_v45 = vsel %vm862_vm2, %v1347_v43, 0  ;;  %v798_v43 = vld [vmem:[%s694_s11] sm:$0xff]  ;;  %s4269_s11 = sld [smem:[#allocation33_spill]] }
 0x657   : > { %v1345_v46 = vpop.permute.xlu1 %1344 }
 0x661   : > { %v3101_v36 = vpop.eup %3100 }
 0x662   : > { %v1240_v37 = vsel %vm862_vm2, %v3101_v36, 0.0 }
 0x663   : > { %1241 = vadd.xlane.f32.xlu0 %v1240_v37 }
 0x679   : > { %1246 = vrot.lane.b32.xlu0 %v3816_v13, %s3422_s14  ;;  %s4270_s14 = sld [smem:[#allocation31_spill]] }
 0x6ec   : > { %v1242_v38 = vpop.xlane.xlu0 %1241 }
 0x6ed   : > { %3102 = vrcp.f32 %v1242_v38  ;;  %v1600_v38 = vld [vmem:[#allocation10 + $0x10] sm:$0xff] }
 0x6f0   : > { %v1247_v39 = vpop.permute.xlu0 %1246 }
 0x6f1   : > { %v1252_v40 = vsel %vm928_vm3, %v1247_v39, 0  ;;  %v1601_v39 = vld [vmem:[#allocation10 + $0x18] sm:$0xff] }
 0x6f2   : > { %2848 = vmatpush3.bf16.msra.mxu0 %v1252_v40  ;;  %v1604_v40 = vpack.c.bf16 %v1601_v39, %v1600_v38 }
 0x6f3   : > { %2859 = vmatprep.subr.bf16.mxu0 %v3411_v0 }
 0x6fa   : > { %v3103_v41 = vpop.eup %3102 }
 0x6fb   : > { %v1244_v42 = vmul.f32 %v3103_v41, %v3101_v36  ;;  %v1598_v41 = vld [vmem:[#allocation10] sm:$0xff] }
 0x6fd   : > { %v1245_v44 = vpack.c.bf16 %v1244_v42, %v1244_v42 }
 0x6ff   : > { %2850 = vmatmul.mubr.msk.bf16.vlgmr.msra.gmra.mxu0 %vm862_vm2, %v1245_v44  ;;  %v1602_v44 = vpack.c.bf16 %v798_v43, %v798_v43 }
 0x700   : > { %2860 = vmatpush3.bf16.xpose.msra.mxu0 %v1352_v45  ;;  %2861 = vmatprep.mubr.msk.bf16.mxu0 %vm3412_vm0, %v3411_v0  ;;  %v1543_v45 = vld [vmem:[%s4179_s8 + $0x10] sm:$0xff] }
 0x701   : > { %2871 = vmatprep.subr.bf16.mxu0 %v3411_v0 }
 0x707   : > { %2862 = vmatmul.mubr.msk.bf16.vlgmr.msra.gmra.mxu0 %vm862_vm2, %v1345_v46  ;;  %v1544_v46 = vld [vmem:[%s4179_s8 + $0x18] sm:$0xff] }
 0x708   : > { %2873 = vmatprep.mubr.msk.bf16.mxu0 %vm3412_vm0, %v3411_v0  ;;  %v1547_v47 = vpack.c.bf16 %v1544_v46, %v1543_v45 }
 0x7bf   : > { %v1288_v50 = vpop.f32.mrf.mxu0 }
 0x7c0   : > { %v1295_v51 = vpack.c.bf16 %v1288_v50, %v1288_v50  ;;  %v1546_v50 = vpack.c.bf16 %v1542_v49, %v1541_v48 }
 0x7c1   : > { %v2851_v52 = vpop.f32.mrf.mxu0 }
 0x7c2   : > { %2856 = vmatmul.mubr.msk.bf16.vlgmr.msra.gmra.mxu1 %vm862_vm2, %v1295_v51 }
 0x7c3   : > { %v1291_v53 = vpop.f32.mrf.mxu0  ;;  %2867 = vmatprep.mubr.msk.bf16.mxu1 %vm3412_vm0, %v3411_v0 }
 0x7c5   : > { %v2852_v54 = vpop.f32.mrf.mxu0 }
 0x7c7   : > { %v1388_v55 = vpop.f32.mrf.mxu0 }
 0x7c8   : > { %v1394_v56 = vmul.f32 0.35355338, %v1388_v55  ;;  %v2701_v55 = vld [vmem:[%s4189_s18] ss:$0 sm:$0xff] }
 0x7c9   : > { %v2863_v57 = vpop.f32.mrf.mxu0 }
 0x7ca   : > { %v1395_v58 = vadd.f32 %v1394_v56, %v3837_v22 }
 0x7cb   : > { %v1391_v59 = vpop.f32.mrf.mxu0 }
 0x7cc   : > { %v1396_v60 = vsel %vm862_vm2, %v1395_v58, -inf }
 0x7cd   : > { %1397 = vmax.xlane.f32.xlu0 %v1396_v60  ;;  %v2864_v61 = vpop.f32.mrf.mxu0 }
 0x7ce   : > { %v2705_v61 = vld [vmem:[%s4269_s11] ss:$0 sm:$0xff]  ;;  %s2486_s11 = scalar_lea.sflag [#allocation4], %s3755_s16 }
 0x7e3   : > { %1408 = vrot.lane.b32.xlu0 %v3816_v13, %s3423_s13  ;;  %v1456_v13 = vld [vmem:[%s4177_s6 + $0x18] sm:$0xff]  ;;  %s4268_s13 = sld [smem:[#allocation40_spill]] }
 0x7e4   : > { %v1458_v10 = vpack.c.bf16 %v1456_v13, %v1456_v13 }
 0x7e6   : > { %v1463_v12 = vsel %vm928_vm3, %v1458_v10, 0 }
 0x7e7   : > { %2872 = vmatpush3.bf16.msra.mxu0 %v1463_v12 }
 0x7e8   : > { %2885 = vmatprep.subr.bf16.mxu0 %v3411_v0 }
 0x7e9   : > { %v2702_v57 = vld [vmem:[%s4268_s13] ss:$0 sm:$0xff] }
 0x856   : > { %v1398_v62 = vpop.xlane.xlu0 %1397 }
 0x857   : > { %v1399_v63 = vsub.f32 %v1395_v58, %v1398_v62 }
 0x859   : > { %v1400_v1 = vmul.f32 1.442695, %v1399_v63 }
 0x85a   : > { %v1409_v2 = vpop.permute.xlu0 %1408 }
 0x85b   : > { %3104 = vpow2.f32 %v1400_v1  ;;  %v1414_v3 = vsel %vm928_vm3, %v1409_v2, 0 }
 0x85c   : > { %2866 = vmatpush3.bf16.msra.mxu1 %v1414_v3 }
 0x85d   : > { %2877 = vmatprep.subr.bf16.mxu1 %v3411_v0 }
 0x868   : > { %v3105_v4 = vpop.eup %3104 }
 0x869   : > { %v1402_v22 = vsel %vm862_vm2, %v3105_v4, 0.0 }
 0x86a   : > { %1403 = vadd.xlane.f32.xlu1 %v1402_v22 }
 0x882   : > { %v1337_v5 = vpop.f32.mrf.mxu1 }
 0x883   : > { %v1343_v6 = vadd.f32 %v1337_v5, %v3882_v21  ;;  %v2703_v5 = vld [vmem:[%s4270_s14] ss:$0 sm:$0xff]  ;;  %s4275_s14 = sld [smem:[#allocation24_spill]] }
 0x884   : > { %v2857_v8 = vpop.f32.mrf.mxu1 }
 0x886   : > { %v1340_v9 = vpop.f32.mrf.mxu1 }
 0x888   : > { %v2858_v11 = vpop.f32.mrf.mxu1 }
 0x889   : > { %p4277_p4 = scmp.ne.s32.totalorder %s4275_s14, 0 }
 0x8f3   : > { %v1404_v14 = vpop.xlane.xlu1 %1403 }
 0x8f4   : > { %3106 = vrcp.f32 %v1404_v14 }
 0x901   : > { %v3107_v15 = vpop.eup %3106 }
 0x902   : > { %v1406_v16 = vmul.f32 %v3107_v15, %v3105_v4 }
 0x904   : > { %v1407_v17 = vpack.c.bf16 %v1406_v16, %v1406_v16 }
 0x906   : > { %2868 = vmatmul.mubr.msk.bf16.vlgmr.msra.gmra.mxu1 %vm862_vm2, %v1407_v17  ;;  %v3996_v17 = vld [vmem:[%s712_s1] sm:$0xff] }
 0x907   : > { %2881 = vmatprep.mubr.msk.bf16.mxu1 %vm3412_vm0, %v3411_v0  ;;  %2878 = vmatpush3.bf16.msra.mxu1 %v1547_v47 }
 0x908   : > { %2879 = vmatprep.subr.bf16.mxu1 %v3411_v0 }
 0x90b   : > { %2880 = vmatpush3.bf16.msra.mxu1 %v1546_v50 }
 0x90c   : > { %2893 = vmatprep.subr.bf16.mxu1 %v3411_v0 }
 0x9c6   : > { %v1450_v18 = vpop.f32.mrf.mxu1 }
 0x9c7   : > { %v1457_v19 = vpack.c.bf16 %v1450_v18, %v1450_v18 }
 0x9c8   : > { %v2869_v20 = vpop.f32.mrf.mxu1 }
 0x9c9   : > { %2874 = vmatmul.mubr.msk.bf16.vlgmr.msra.gmra.mxu0 %vm862_vm2, %v1457_v19 }
 0x9ca   : > { %v1453_v21 = vpop.f32.mrf.mxu1  ;;  %2889 = vmatprep.mubr.msk.bf16.mxu0 %vm3412_vm0, %v3411_v0  ;;  %2886 = vmatpush3.bf16.msra.mxu0 %v1604_v40 }
 0x9cb   : > { %2887 = vmatprep.subr.bf16.mxu0 %v3411_v0 }
 0x9cc   : > { %v2870_v23 = vpop.f32.mrf.mxu1 }
 0xa89   : > { %v1499_v24 = vpop.f32.mrf.mxu0 }
 0xa8a   : > { %v1505_v26 = vadd.f32 %v1499_v24, %v1343_v6 }
 0xa8b   : > { %v2875_v27 = vpop.f32.mrf.mxu0 }
 0xa8c   : > { %v1513_v28 = vadd.f32 %v2700_v25, %v1505_v26 }
 0xa8d   : > { %v1502_v29 = vpop.f32.mrf.mxu0 }
 0xa8e   : > { %v1514_v30 = vadd.f32 %v1513_v28, %v3804_v7  ;;  %v1599_v7 = vld [vmem:[#allocation10 + $0x8] sm:$0xff] }
 0xa8f   : > { %v2876_v31 = vpop.f32.mrf.mxu0  ;;  %v1603_v42 = vpack.c.bf16 %v1599_v7, %v1598_v41 }
 0xa90   : > { %v1515_v32 = vsel %vm813_vm1, %v1514_v30, 0.0 }
 0xa91   : > { %1516 = vadd.xlane.f32.xlu1 %v1515_v32  ;;  %2888 = vmatpush3.bf16.msra.mxu0 %v1603_v42 }
 0xa92   : > { %2899 = vmatprep.subr.bf16.mxu0 %v3411_v0 }
 0xa94   : > { %2890 = vmatmul.mubr.msk.bf16.vlgmr.msra.gmra.mxu0 %vm813_vm1, %v1602_v44 }
 0xa95   : > { %2901 = vmatprep.mubr.msk.bf16.mxu0 %vm3412_vm0, %v3411_v0 }
 0xb1a   : > { %v1517_v33 = vpop.xlane.xlu1 %1516 }
 0xb1b   : > { %v1519_v34 = vmul.f32 0.03125, %v1517_v33 }
 0xb1d   : > { %v1520_v35 = vsub.f32 %v1514_v30, %v1519_v34 }
 0xb1f   : > { %v1521_v36 = vmul.f32 %v1520_v35, %v1520_v35 }
 0xb21   : > { %v1522_v37 = vsel %vm813_vm1, %v1521_v36, 0.0 }
 0xb22   : > { %1523 = vadd.xlane.f32.xlu1 %v1522_v37 }
 0xb54   : > { %v1649_v62 = vpop.f32.mrf.mxu0 }
 0xb55   : > { %v1650_v63 = vadd.f32 %v2705_v61, %v1649_v62 }
 0xb56   : > { %v2891_v1 = vpop.f32.mrf.mxu0 }
 0xb57   : > { %v3971_v2 = vpack.c.bf16 %v1650_v63, %v1650_v63 }
 0xb58   : > { %v1652_v3 = vpop.f32.mrf.mxu0 }
 0xb59   : > { %1773 = vrot.lane.b32.xlu1 %v3971_v2, %s3413_s29  ;;  %v1662_v4 = vsel %vm862_vm2, %v3971_v2, 0 }
 0xb5a   : > { %v2892_v22 = vpop.f32.mrf.mxu0 }
 0xbab   : > { %v1524_v51 = vpop.xlane.xlu1 %1523 }
 0xbac   : > { %v1525_v52 = vmul.f32 0.03125, %v1524_v51 }
 0xbae   : > { %v1528_v53 = vadd.f32 1e-05, %v1525_v52 }
 0xbb0   : > { %3108 = vrsqrt.f32 %v1528_v53  ;;  %v1767_v53 = vld [vmem:[#allocation11] sm:$0xff] }
 0xbbd   : > { %v3109_v54 = vpop.eup %3108 }
 0xbbe   : > { %v1530_v56 = vmul.f32 %v3109_v54, %v1520_v35  ;;  %v1769_v54 = vpack.c.bf16 %v1767_v53, %v1767_v53 }
 0xbc0   : > { %v1535_v58 = vmul.f32 %v2701_v55, %v1530_v56  ;;  %v1936_v55 = vsel %vm928_vm3, %v1769_v54, 0  ;;  %v1883_v56 = vld [vmem:[#allocation11 + $0x8] sm:$0xff] }
 0xbc2   : > { %v3961_v59 = vadd.f32 %v2702_v57, %v1535_v58  ;;  %v1885_v57 = vpack.c.bf16 %v1883_v56, %v1883_v56 }
 0xbc4   : > { %v1545_v60 = vpack.c.bf16 %v3961_v59, %v3961_v59  ;;  %v1890_v58 = vsel %vm928_vm3, %v1885_v57, 0 }
 0xbc6   : > { %2882 = vmatmul.mubr.msk.bf16.vlgmr.msra.gmra.mxu1 %vm813_vm1, %v1545_v60 }
 0xbc7   : > { %2895 = vmatprep.mubr.msk.bf16.mxu1 %vm3412_vm0, %v3411_v0  ;;  %2894 = vmatpush3.bf16.xpose.msra.mxu1 %v1662_v4 }
 0xbc8   : > { %2905 = vmatprep.subr.bf16.mxu1 %v3411_v0 }
 0xbcb   : > { %v1774_v8 = vpop.permute.xlu1 %1773 }
 0xbcc   : > { %v1779_v11 = vsel %vm862_vm2, %v1774_v8, 0 }
 0xc86   : > { %v1592_v6 = vpop.f32.mrf.mxu1 }
 0xc87   : > { %v1593_v9 = vadd.f32 %v2703_v5, %v1592_v6 }
 0xc88   : > { %v2883_v13 = vpop.f32.mrf.mxu1 }
 0xc89   : > { %v3981_v10 = vpack.c.bf16 %v1593_v9, %v1593_v9 }
 0xc8a   : > { %v1595_v12 = vpop.f32.mrf.mxu1 }
 0xc8b   : > { %1771 = vrot.lane.b32.xlu0 %v3981_v10, %s3413_s29  ;;  %2896 = vmatmul.mubr.msk.bf16.vlgmr.msra.gmra.mxu1 %vm862_vm2, %v3981_v10 }
 0xc8c   : > { %v2884_v14 = vpop.f32.mrf.mxu1  ;;  %2906 = vmatpush3.bf16.xpose.msra.mxu1 %v1779_v11  ;;  %2907 = vmatprep.mubr.msk.bf16.mxu1 %vm3412_vm0, %v3411_v0 }
 0xc8d   : > { %2917 = vmatprep.subr.bf16.mxu1 %v3411_v0 }
 0xcfd   : > { %v1772_v15 = vpop.permute.xlu0 %1771 }
 0xcfe   : > { %2908 = vmatmul.mubr.msk.bf16.vlgmr.msra.gmra.mxu1 %vm862_vm2, %v1772_v15 }
 0xcff   : > { %2919 = vmatprep.mubr.msk.bf16.mxu1 %vm3412_vm0, %v3411_v0  ;;  %2918 = vmatpush3.bf16.msra.mxu1 %v1890_v58 }
 0xd00   : > { %2929 = vmatprep.subr.bf16.mxu1 %v3411_v0 }
 0xd4b   : > { %v1698_v16 = vpop.f32.mrf.mxu1 }
 0xd4c   : > { %v1704_v18 = vmul.f32 0.35355338, %v1698_v16 }
 0xd4d   : > { %v2897_v19 = vpop.f32.mrf.mxu1 }
 0xd4e   : > { %v1705_v20 = vadd.f32 %v1704_v18, %v3996_v17 }
 0xd4f   : > { %v1701_v21 = vpop.f32.mrf.mxu1 }
 0xd50   : > { %v1706_v23 = vsel %vm862_vm2, %v1705_v20, -inf }
 0xd51   : > { %1707 = vmax.xlane.f32.xlu0 %v1706_v23  ;;  %v2898_v24 = vpop.f32.mrf.mxu1 }
 0xdbe   : > { %v1815_v25 = vpop.f32.mrf.mxu1 }
 0xdbf   : > { %v1821_v26 = vmul.f32 0.35355338, %v1815_v25 }
 0xdc0   : > { %v2909_v27 = vpop.f32.mrf.mxu1 }
 0xdc1   : > { %v1822_v28 = vadd.f32 %v1821_v26, %v3996_v17 }
 0xdc2   : > { %v1818_v29 = vpop.f32.mrf.mxu1 }
 0xdc3   : > { %v1823_v30 = vsel %vm862_vm2, %v1822_v28, -inf }
 0xdc4   : > { %1824 = vmax.xlane.f32.xlu1 %v1823_v30  ;;  %v2910_v31 = vpop.f32.mrf.mxu1 }
 0xdd5   : > { %1835 = vrot.lane.b32.xlu1 %v3971_v2, %s3415_s4 }
 0xdd9   : > { %1980 = vrot.lane.b32.xlu1 %v3971_v2, %s3418_s3 }
 0xdda   : > { %v1708_v32 = vpop.xlane.xlu0 %1707 }
 0xddb   : > { %v1709_v33 = vsub.f32 %v1705_v20, %v1708_v32 }
 0xddd   : > { %v1710_v34 = vmul.f32 1.442695, %v1709_v33 }
 0xddf   : > { %3110 = vpow2.f32 %v1710_v34 }
 0xdec   : > { %v3111_v35 = vpop.eup %3110 }
 0xded   : > { %v1712_v36 = vsel %vm862_vm2, %v3111_v35, 0.0 }
 0xdee   : > { %1713 = vadd.xlane.f32.xlu0 %v1712_v36 }
 0xe4d   : > { %v1825_v37 = vpop.xlane.xlu1 %1824 }
 0xe4e   : > { %v1826_v38 = vsub.f32 %v1822_v28, %v1825_v37 }
 0xe50   : > { %v1827_v39 = vmul.f32 1.442695, %v1826_v38 }
 0xe51   : > { %v1836_v47 = vpop.permute.xlu1 %1835 }
 0xe52   : > { %3112 = vpow2.f32 %v1827_v39  ;;  %v1841_v49 = vsel %vm928_vm3, %v1836_v47, 0 }
 0xe55   : > { %v1981_v3 = vpop.permute.xlu1 %1980 }
 0xe56   : > { %v1986_v6 = vsel %vm862_vm2, %v1981_v3, 0 }
 0xe5f   : > { %v3113_v40 = vpop.eup %3112 }
 0xe60   : > { %v1829_v41 = vsel %vm862_vm2, %v3113_v40, 0.0 }
 0xe61   : > { %1830 = vadd.xlane.f32.xlu0 %v1829_v41 }
 0xe77   : > { %1719 = vrot.lane.b32.xlu0 %v3971_v2, %s3414_s27  ;;  %v1714_v7 = vpop.xlane.xlu0 %1713  ;;  %s4271_s27 = sld [smem:[#allocation35_spill]] }
 0xe78   : > { %3114 = vrcp.f32 %v1714_v7 }
 0xe7b   : > { %1978 = vrot.lane.b32.xlu0 %v3981_v10, %s3418_s3  ;;  %s2729_s3 = sshll.u32 %s3551_s2, 7 }
 0xe85   : > { %v3115_v42 = vpop.eup %3114 }
 0xe86   : > { %v1716_v44 = vmul.f32 %v3115_v42, %v3111_v35  ;;  %v2090_v42 = vld [vmem:[#allocation11 + $0x10] sm:$0xff] }
 0xe88   : > { %v1717_v48 = vpack.c.bf16 %v1716_v44, %v1716_v44 }
 0xeea   : > { %v1831_v43 = vpop.xlane.xlu0 %1830 }
 0xeeb   : > { %3116 = vrcp.f32 %v1831_v43  ;;  %v2092_v43 = vpack.c.bf16 %v2090_v42, %v2090_v42 }
 0xeed   : > { %v2097_v44 = vsel %vm928_vm3, %v2092_v43, 0 }
 0xeee   : > { %v1720_v45 = vpop.permute.xlu0 %1719 }
 0xeef   : > { %v1725_v46 = vsel %vm928_vm3, %v1720_v45, 0 }
 0xef0   : > { %2900 = vmatpush3.bf16.msra.mxu0 %v1725_v46 }
 0xef1   : > { %2911 = vmatprep.subr.bf16.mxu0 %v3411_v0 }
 0xef2   : > { %v1979_v13 = vpop.permute.xlu0 %1978 }
 0xef3   : > { %2902 = vmatmul.mubr.msk.bf16.vlgmr.msra.gmra.mxu0 %vm862_vm2, %v1717_v48 }
 0xef4   : > { %2912 = vmatpush3.bf16.msra.mxu0 %v1841_v49  ;;  %2913 = vmatprep.mubr.msk.bf16.mxu0 %vm3412_vm0, %v3411_v0 }
 0xef5   : > { %2923 = vmatprep.subr.bf16.mxu0 %v3411_v0 }
 0xef8   : > { %v3117_v50 = vpop.eup %3116 }
 0xef9   : > { %v1833_v51 = vmul.f32 %v3117_v50, %v3113_v40 }
 0xefb   : > { %v1834_v52 = vpack.c.bf16 %v1833_v51, %v1833_v51 }
 0xefd   : > { %2914 = vmatmul.mubr.msk.bf16.vlgmr.msra.gmra.mxu0 %vm862_vm2, %v1834_v52 }
 0xefe   : > { %2925 = vmatprep.mubr.msk.bf16.mxu0 %vm3412_vm0, %v3411_v0  ;;  %2924 = vmatpush3.bf16.msra.mxu0 %v1936_v55 }
 0xeff   : > { %2935 = vmatprep.subr.bf16.mxu0 %v3411_v0 }
 0xfb3   : > { %v1761_v60 = vpop.f32.mrf.mxu0 }
 0xfb4   : > { %v1768_v61 = vpack.c.bf16 %v1761_v60, %v1761_v60 }
 0xfb5   : > { %v2903_v62 = vpop.f32.mrf.mxu0 }
 0xfb6   : > { %2926 = vmatmul.mubr.msk.bf16.vlgmr.msra.gmra.mxu0 %vm862_vm2, %v1768_v61 }
 0xfb7   : > { %v1764_v63 = vpop.f32.mrf.mxu0  ;;  %2937 = vmatprep.mubr.msk.bf16.mxu0 %vm3412_vm0, %v3411_v0 }
 0xfb9   : > { %v2904_v1 = vpop.f32.mrf.mxu0 }
 0xfbd   : > { %v1877_v4 = vpop.f32.mrf.mxu0 }
 0xfbe   : > { %v1884_v22 = vpack.c.bf16 %v1877_v4, %v1877_v4 }
 0xfbf   : > { %v2915_v5 = vpop.f32.mrf.mxu0 }
 0xfc0   : > { %2920 = vmatmul.mubr.msk.bf16.vlgmr.msra.gmra.mxu1 %vm862_vm2, %v1884_v22 }
 0xfc1   : > { %2930 = vmatpush3.bf16.xpose.msra.mxu1 %v1986_v6  ;;  %v1880_v8 = vpop.f32.mrf.mxu0  ;;  %2931 = vmatprep.mubr.msk.bf16.mxu1 %vm3412_vm0, %v3411_v0 }
 0xfc2   : > { %2941 = vmatprep.subr.bf16.mxu1 %v3411_v0 }
 0xfc3   : > { %v2916_v9 = vpop.f32.mrf.mxu0 }
 0xfc8   : > { %2932 = vmatmul.mubr.msk.bf16.vlgmr.msra.gmra.mxu1 %vm862_vm2, %v1979_v13 }
 0xfc9   : > { %2943 = vmatprep.mubr.msk.bf16.mxu1 %vm3412_vm0, %v3411_v0  ;;  %2942 = vmatpush3.bf16.msra.mxu1 %v2097_v44 }
 0xfca   : > { %2953 = vmatprep.subr.bf16.mxu1 %v3411_v0 }
0x1076   : > { %v1972_v11 = vpop.f32.mrf.mxu0 }
0x1078   : > { %v2927_v12 = vpop.f32.mrf.mxu0 }
0x107a   : > { %v1975_v14 = vpop.f32.mrf.mxu0 }
0x107c   : > { %v2928_v15 = vpop.f32.mrf.mxu0 }
0x1080   : > { %v1926_v16 = vpop.f32.mrf.mxu1 }
0x1081   : > { %v4037_v18 = vadd.f32 %v1972_v11, %v1926_v16 }
0x1082   : > { %v2921_v19 = vpop.f32.mrf.mxu1 }
0x1084   : > { %v1929_v20 = vpop.f32.mrf.mxu1 }
0x1086   : > { %v2922_v21 = vpop.f32.mrf.mxu1 }
0x1087   : > { %v2719_v21 = vld [vmem:[%s4271_s27] ss:$0 sm:$0xff] }
0x1088   : > { %v2022_v23 = vpop.f32.mrf.mxu1 }
0x1089   : > { %v2028_v24 = vmul.f32 0.35355338, %v2022_v23 }
0x108a   : > { %v2933_v25 = vpop.f32.mrf.mxu1 }
0x108b   : > { %v2029_v26 = vadd.f32 %v2028_v24, %v3996_v17 }
0x108c   : > { %v2025_v27 = vpop.f32.mrf.mxu1 }
0x108d   : > { %v2030_v28 = vsel %vm862_vm2, %v2029_v26, -inf }
0x108e   : > { %2031 = vmax.xlane.f32.xlu1 %v2030_v28  ;;  %v2934_v29 = vpop.f32.mrf.mxu1 }
0x109f   : > { %2142 = vrot.lane.b32.xlu1 %v3971_v2, %s3421_s20 }
0x10a3   : > { %2140 = vrot.lane.b32.xlu1 %v3981_v10, %s3421_s20 }
0x1117   : > { %v2032_v30 = vpop.xlane.xlu1 %2031 }
0x1118   : > { %v2033_v31 = vsub.f32 %v2029_v26, %v2032_v30 }
0x111a   : > { %v2034_v32 = vmul.f32 1.442695, %v2033_v31 }
0x111b   : > { %v2143_v39 = vpop.permute.xlu1 %2142 }
0x111c   : > { %3118 = vpow2.f32 %v2034_v32  ;;  %v2148_v41 = vsel %vm862_vm2, %v2143_v39, 0 }
0x111f   : > { %v2141_v7 = vpop.permute.xlu1 %2140 }
0x1129   : > { %v3119_v33 = vpop.eup %3118 }
0x112a   : > { %v2036_v34 = vsel %vm862_vm2, %v3119_v33, 0.0 }
0x112b   : > { %2037 = vadd.xlane.f32.xlu0 %v2036_v34 }
0x1141   : > { %2042 = vrot.lane.b32.xlu0 %v3971_v2, %s3419_s21  ;;  %s4272_s21 = sld [smem:[#allocation38_spill]] }
0x1147   : > { %v2399_v42 = vld [vmem:[%s4272_s21 + $0x28] sm:$0xff] }
0x11b4   : > { %v2038_v35 = vpop.xlane.xlu0 %2037 }
0x11b5   : > { %3120 = vrcp.f32 %v2038_v35  ;;  %v2338_v35 = vld [vmem:[#allocation13 + $0x10] sm:$0xff] }
0x11b8   : > { %v2043_v36 = vpop.permute.xlu0 %2042 }
0x11b9   : > { %v2048_v37 = vsel %vm928_vm3, %v2043_v36, 0  ;;  %v2339_v36 = vld [vmem:[#allocation13 + $0x18] sm:$0xff] }
0x11ba   : > { %2936 = vmatpush3.bf16.msra.mxu0 %v2048_v37  ;;  %v2342_v37 = vpack.c.bf16 %v2339_v36, %v2338_v35 }
0x11bb   : > { %2947 = vmatprep.subr.bf16.mxu0 %v3411_v0 }
0x11c2   : > { %v3121_v10 = vpop.eup %3120 }
0x11c3   : > { %v2040_v38 = vmul.f32 %v3121_v10, %v3119_v33  ;;  %v2336_v10 = vld [vmem:[#allocation13] sm:$0xff] }
0x11c5   : > { %v2041_v40 = vpack.c.bf16 %v2040_v38, %v2040_v38  ;;  %v2337_v38 = vld [vmem:[#allocation13 + $0x8] sm:$0xff] }
0x11c6   : > { %v2341_v39 = vpack.c.bf16 %v2337_v38, %v2336_v10 }
0x11c7   : > { %2938 = vmatmul.mubr.msk.bf16.vlgmr.msra.gmra.mxu0 %vm862_vm2, %v2041_v40  ;;  %v2401_v40 = vld [vmem:[%s4272_s21 + $0x38] sm:$0xff] }
0x11c8   : > { %2948 = vmatpush3.bf16.xpose.msra.mxu0 %v2148_v41  ;;  %2949 = vmatprep.mubr.msk.bf16.mxu0 %vm3412_vm0, %v3411_v0  ;;  %v2398_v41 = vld [vmem:[%s4272_s21 + $0x20] sm:$0xff] }
0x11c9   : > { %2959 = vmatprep.subr.bf16.mxu0 %v3411_v0  ;;  %v2405_v43 = vpack.c.bf16 %v2399_v42, %v2398_v41 }
0x11cf   : > { %2950 = vmatmul.mubr.msk.bf16.vlgmr.msra.gmra.mxu0 %vm862_vm2, %v2141_v7 }
0x11d0   : > { %2961 = vmatprep.mubr.msk.bf16.mxu0 %vm3412_vm0, %v3411_v0 }
0x1287   : > { %v2084_v45 = vpop.f32.mrf.mxu0 }
0x1288   : > { %v2091_v46 = vpack.c.bf16 %v2084_v45, %v2084_v45 }
0x1289   : > { %v2939_v47 = vpop.f32.mrf.mxu0 }
0x128a   : > { %2944 = vmatmul.mubr.msk.bf16.vlgmr.msra.gmra.mxu1 %vm862_vm2, %v2091_v46 }
0x128b   : > { %v2087_v48 = vpop.f32.mrf.mxu0  ;;  %2955 = vmatprep.mubr.msk.bf16.mxu1 %vm3412_vm0, %v3411_v0 }
0x128c   : > { %v2720_v48 = vld [vmem:[%s4189_s18 + $0x1] ss:$0 sm:$0xff] }
0x128d   : > { %v2940_v49 = vpop.f32.mrf.mxu0 }
0x128f   : > { %v2184_v50 = vpop.f32.mrf.mxu0 }
0x1290   : > { %v2190_v51 = vmul.f32 0.35355338, %v2184_v50  ;;  %v2721_v50 = vld [vmem:[%s4268_s13 + $0x1] ss:$0 sm:$0xff] }
0x1291   : > { %v2951_v52 = vpop.f32.mrf.mxu0 }
0x1292   : > { %v2191_v53 = vadd.f32 %v2190_v51, %v3996_v17 }
0x1293   : > { %v2187_v54 = vpop.f32.mrf.mxu0 }
0x1294   : > { %v2192_v55 = vsel %vm862_vm2, %v2191_v53, -inf  ;;  %v2396_v54 = vld [vmem:[%s4272_s21 + $0x10] sm:$0xff] }
0x1295   : > { %2193 = vmax.xlane.f32.xlu0 %v2192_v55  ;;  %v2952_v56 = vpop.f32.mrf.mxu0  ;;  %v2397_v55 = vld [vmem:[%s4272_s21 + $0x18] sm:$0xff] }
0x1296   : > { %v2404_v56 = vpack.c.bf16 %v2397_v55, %v2396_v54 }
0x12ab   : > { %2204 = vrot.lane.b32.xlu0 %v3971_v2, %s3420_s10  ;;  %v2252_v2 = vld [vmem:[#allocation11 + $0x18] sm:$0xff]  ;;  %s795_s10 = scalar_lea.vmem [#allocation14], %s3758_s12 }
0x12ac   : > { %v2254_v5 = vpack.c.bf16 %v2252_v2, %v2252_v2  ;;  %s2499_s20 = sshll.u32 %s795_s10, 4  ;;  %s2500_s20 = int_to_ptr.vmem [resolvable:$true] %s2499_s20 }
0x12ad   : > { %s3320_s25 = scalar_lea.vmem %s2500_s20, 128 }
0x12ae   : > { %v2259_v8 = vsel %vm928_vm3, %v2254_v5, 0  ;;  %p3321_p2 = scmp.ne.s32.totalorder %s2500_s20, %s3320_s25 }
0x12af   : > { %2960 = vmatpush3.bf16.msra.mxu0 %v2259_v8 }
0x12b0   : > { %2973 = vmatprep.subr.bf16.mxu0 %v3411_v0  ;;  %p3322_p8 = pnand %p3321_p2, %p4277_p4 }
0x12b2   : > { %p3323_p11 = pneg %p3322_p8 }
0x131e   : > { %v2194_v57 = vpop.xlane.xlu0 %2193 }
0x131f   : > { %v2195_v58 = vsub.f32 %v2191_v53, %v2194_v57  ;;  %v2394_v57 = vld [vmem:[%s4272_s21] sm:$0xff] }
0x1321   : > { %v2196_v60 = vmul.f32 1.442695, %v2195_v58  ;;  %v2395_v58 = vld [vmem:[%s4272_s21 + $0x8] sm:$0xff] }
0x1322   : > { %v2205_v61 = vpop.permute.xlu0 %2204 }
0x1323   : > { %3122 = vpow2.f32 %v2196_v60  ;;  %v2210_v62 = vsel %vm928_vm3, %v2205_v61, 0  ;;  %v2403_v60 = vpack.c.bf16 %v2395_v58, %v2394_v57  ;;  %v2722_v61 = vld [vmem:[%s4273_s28] ss:$0 sm:$0xff]  ;;  %s2497_s28 = scalar_lea.hbm %s4276_s9, %s2729_s3 }
0x1324   : > { %2954 = vmatpush3.bf16.msra.mxu1 %v2210_v62 }
0x1325   : > { %2965 = vmatprep.subr.bf16.mxu1 %v3411_v0 }
0x1330   : > { %v3123_v63 = vpop.eup %3122 }
0x1331   : > { %v2198_v17 = vsel %vm862_vm2, %v3123_v63, 0.0 }
0x1332   : > { %2199 = vadd.xlane.f32.xlu1 %v2198_v17 }
0x134a   : > { %v2133_v1 = vpop.f32.mrf.mxu1 }
0x134b   : > { %v2139_v3 = vadd.f32 %v2133_v1, %v4037_v18 }
0x134c   : > { %v2945_v4 = vpop.f32.mrf.mxu1 }
0x134e   : > { %v2136_v22 = vpop.f32.mrf.mxu1 }
0x134f   : > { %v2724_v22 = vld [vmem:[%s4274_s0] ss:$0 sm:$0xff]  ;;  %s3424_s0 = smov [#allocation14]  }
0x1350   : > { %v2946_v6 = vpop.f32.mrf.mxu1  ;;  %s3324_s1 = sshll.u32 %s3424_s0, 4  ;;  %s3325_s1 = int_to_ptr.vmem [resolvable:$false] %s3324_s1 }
0x1351   : > { %s3326_s2 = scalar_lea.vmem %s3325_s1, 256  ;;  %p3327_p0 = scmp.lt.s32.totalorder %s2500_s20, %s3325_s1 }
0x1352   : > { %p3328_p1 = scmp.lt.s32.totalorder %s3326_s2, %s3320_s25 }
0x1354   : > { %p3329_p6 = por %p3328_p1, %p3327_p0 }
0x1356   : > { %p3330_p12 = pnand %p3329_p6, %p3323_p11 }
0x13bb   : > { %v2200_v9 = vpop.xlane.xlu1 %2199 }
0x13bc   : > { %3124 = vrcp.f32 %v2200_v9 }
0x13c9   : > { %v3125_v13 = vpop.eup %3124 }
0x13ca   : > { %v2202_v11 = vmul.f32 %v3125_v13, %v3123_v63 }
0x13cc   : > { %v2203_v12 = vpack.c.bf16 %v2202_v11, %v2202_v11 }
0x13ce   : > { %2956 = vmatmul.mubr.msk.bf16.vlgmr.msra.gmra.mxu1 %vm862_vm2, %v2203_v12 }
0x13cf   : > { %2969 = vmatprep.mubr.msk.bf16.mxu1 %vm3412_vm0, %v3411_v0  ;;  %2966 = vmatpush3.bf16.msra.mxu1 %v2342_v37 }
0x13d0   : > { %2967 = vmatprep.subr.bf16.mxu1 %v3411_v0 }
0x13d3   : > { %2968 = vmatpush3.bf16.msra.mxu1 %v2341_v39 }
0x148e   : > { %v2246_v14 = vpop.f32.mrf.mxu1 }
0x148f   : > { %v2253_v15 = vpack.c.bf16 %v2246_v14, %v2246_v14 }
0x1490   : > { %v2957_v16 = vpop.f32.mrf.mxu1 }
0x1491   : > { %2962 = vmatmul.mubr.msk.bf16.vlgmr.msra.gmra.mxu0 %vm862_vm2, %v2253_v15 }
0x1492   : > { %v2249_v18 = vpop.f32.mrf.mxu1  ;;  %2981 = vmatprep.mubr.msk.bf16.mxu0 %vm3412_vm0, %v3411_v0 }
0x1494   : > { %v2958_v19 = vpop.f32.mrf.mxu1 }
0x1551   : > { %v2295_v20 = vpop.f32.mrf.mxu0 }
0x1552   : > { %v2301_v23 = vadd.f32 %v2295_v20, %v2139_v3 }
0x1553   : > { %v2963_v24 = vpop.f32.mrf.mxu0 }
0x1554   : > { %v2309_v25 = vadd.f32 %v2719_v21, %v2301_v23  ;;  %v2726_v24 = vld [vmem:[%s4189_s18 + $0x2] ss:$0 sm:$0xff] }
0x1555   : > { %v2298_v26 = vpop.f32.mrf.mxu0 }
0x1556   : > { %v2310_v27 = vadd.f32 %v2309_v25, %v3961_v59  ;;  %v2400_v59 = vld [vmem:[%s4272_s21 + $0x30] sm:$0xff]  ;;  %v2727_v26 = vld [vmem:[%s4268_s13 + $0x2] ss:$0 sm:$0xff] }
0x1557   : > { %v2964_v28 = vpop.f32.mrf.mxu0  ;;  %v2406_v7 = vpack.c.bf16 %v2401_v40, %v2400_v59 }
0x1558   : > { %v2311_v29 = vsel %vm813_vm1, %v2310_v27, 0.0 }
0x1559   : > { %2312 = vadd.xlane.f32.xlu1 %v2311_v29  ;;  %2974 = vmatpush3.bf16.msra.mxu0 %v2406_v7 }
0x155a   : > { %2975 = vmatprep.subr.bf16.mxu0 %v3411_v0 }
0x155d   : > { %2976 = vmatpush3.bf16.msra.mxu0 %v2405_v43 }
0x155e   : > { %2977 = vmatprep.subr.bf16.mxu0 %v3411_v0 }
0x1561   : > { %2978 = vmatpush3.bf16.msra.mxu0 %v2404_v56 }
0x1562   : > { %2979 = vmatprep.subr.bf16.mxu0 %v3411_v0 }
0x1565   : > { %2980 = vmatpush3.bf16.msra.mxu0 %v2403_v60 }
0x15e2   : > { %v2313_v30 = vpop.xlane.xlu1 %2312 }
0x15e3   : > { %v2314_v31 = vmul.f32 0.03125, %v2313_v30 }
0x15e5   : > { %v2315_v32 = vsub.f32 %v2310_v27, %v2314_v31 }
0x15e7   : > { %v2316_v33 = vmul.f32 %v2315_v32, %v2315_v32 }
0x15e9   : > { %v2317_v34 = vsel %vm813_vm1, %v2316_v33, 0.0 }
0x15ea   : > { %2318 = vadd.xlane.f32.xlu1 %v2317_v34 }
0x1673   : > { %v2319_v44 = vpop.xlane.xlu1 %2318 }
0x1674   : > { %v2320_v45 = vmul.f32 0.03125, %v2319_v44 }
0x1676   : > { %v2323_v46 = vadd.f32 1e-05, %v2320_v45 }
0x1678   : > { %3126 = vrsqrt.f32 %v2323_v46 }
0x1685   : > { %v3127_v47 = vpop.eup %3126 }
0x1686   : > { %v2325_v49 = vmul.f32 %v3127_v47, %v2315_v32 }
0x1688   : > { %v2330_v51 = vmul.f32 %v2720_v48, %v2325_v49 }
0x168a   : > { %v2335_v52 = vadd.f32 %v2721_v50, %v2330_v51 }
0x168c   : > { %v2340_v53 = vpack.c.bf16 %v2335_v52, %v2335_v52 }
0x168e   : > { %2970 = vmatmul.mubr.msk.bf16.vlgmr.msra.gmra.mxu1 %vm813_vm1, %v2340_v53 }
0x174e   : > { %v2387_v62 = vpop.f32.mrf.mxu1 }
0x174f   : > { %v2388_v63 = vadd.f32 %v2722_v61, %v2387_v62 }
0x1750   : > { %v2971_v17 = vpop.f32.mrf.mxu1 }
0x1751   : > { %v2393_v1 = vmax.f32 %v2388_v63, 0.0 }
0x1752   : > { %v2390_v3 = vpop.f32.mrf.mxu1 }
0x1753   : > { %v2402_v0 = vpack.c.bf16 %v2393_v1, %v2393_v1 }
0x1754   : > { %v2972_v4 = vpop.f32.mrf.mxu1 }
0x1755   : > { %2982 = vmatmul.mubr.msk.bf16.vlgmr.msra.gmra.mxu0 %vm2414_vm4, %v2402_v0 }
0x1815   : > { %v2452_v2 = vpop.f32.mrf.mxu0 }
0x1816   : > { %v2453_v5 = vadd.f32 %v2724_v22, %v2452_v2 }
0x1817   : > { %v2983_v6 = vpop.f32.mrf.mxu0 }
0x1818   : > { %v2458_v8 = vadd.f32 %v2453_v5, %v2335_v52 }
0x1819   : > { %v2455_v9 = vpop.f32.mrf.mxu0 }
0x181a   : > { %v2459_v13 = vsel %vm813_vm1, %v2458_v8, 0.0 }
0x181b   : > { %2460 = vadd.xlane.f32.xlu1 %v2459_v13  ;;  %v2984_v11 = vpop.f32.mrf.mxu0 }
0x18a4   : > { %v2461_v12 = vpop.xlane.xlu1 %2460 }
0x18a5   : > { %v2462_v14 = vmul.f32 0.03125, %v2461_v12 }
0x18a7   : > { %v2463_v15 = vsub.f32 %v2458_v8, %v2462_v14 }
0x18a9   : > { %v2464_v16 = vmul.f32 %v2463_v15, %v2463_v15 }
0x18ab   : > { %v2465_v18 = vsel %vm813_vm1, %v2464_v16, 0.0 }
0x18ac   : > { %2466 = vadd.xlane.f32.xlu1 %v2465_v18 }
0x1935   : > { %v2467_v19 = vpop.xlane.xlu1 %2466 }
0x1936   : > { %v2468_v20 = vmul.f32 0.03125, %v2467_v19 }
0x1938   : > { %v2471_v21 = vadd.f32 1e-05, %v2468_v20 }
0x193a   : > { %3128 = vrsqrt.f32 %v2471_v21 }
0x1947   : > { %v3129_v23 = vpop.eup %3128 }
0x1948   : > { %v2473_v25 = vmul.f32 %v3129_v23, %v2463_v15 }
0x194a   : > { %v2478_v27 = vmul.f32 %v2726_v24, %v2473_v25 }
0x194c   : > { %v2483_v28 = vadd.f32 %v2727_v26, %v2478_v27 }
0x194e   : > { %2484 = vst.msk [vmem:[%s795_s10] sm:$0xff] %vm813_vm1, %v2483_v28 }
0x194f   : > { %3333 = shalt.err (!%p3330_p12)
}
0x1950   : > { %s3334_s12 = scalar_lea.hbm %s2497_s28, 128  ;;  %s3338_s27 = scalar_lea.hbm %s4276_s9, 256 }
0x1951   : > { %p3335_p10 = scmp.ne.s32.totalorder %s2497_s28, %s3334_s12  ;;  %p3339_p5 = scmp.lt.s32.totalorder %s2497_s28, %s4276_s9 }
0x1952   : > { %p3340_p3 = scmp.lt.s32.totalorder %s3338_s27, %s3334_s12 }
0x1953   : > { %p3336_p13 = pnand %p3335_p10, %p4277_p4 }
0x1954   : > { %p3341_p7 = por %p3340_p3, %p3339_p5 }
0x1955   : > { %p3337_p9 = pneg %p3336_p13 }
0x1957   : > { %p3342_p2 = pnand %p3341_p7, %p3337_p9 }
0x1959   : > { %3345 = shalt.err (!%p3342_p2)
}
0x195a   : > { %3005 = dma.vmem_to_hbm [thread:$0]  (%p4277_p4), %s2500_s20, 128, %s2497_s28, %s2486_s11  }
0x195b PF: > { %s4278_s10 = sld [smem:[#allocation21_spill]]  ;;  %p4281_p11 = scmp.ge.s32.totalorder %s3400_s24, 2 }
0x195c   : > { %s4279_s26 = sld [smem:[#allocation22_spill]] }
0x1961   : > { %s2511_s30 = sand.u32 1, %s4278_s10  }
0x1962   : > { %p4280_p8 = scmp.ne.s32.totalorder %s4279_s26, 0  ;;  %s2512_s25 = scalar_lea.sflag [#allocation4], %s2511_s30 }
0x1964   : > { %p3031_p0 = pnand %p4281_p11, %p4280_p8 }
0x1966   : > { %p3032_p1 = pneg %p3031_p0 }
0x1968   : > { %3383 = dma.done.wait (%p3032_p1), %s2512_s25, 128  }
0x1969   : > { %3385 = vsyncadd (%p3032_p1), %s2512_s25, 4294967168  ;;  %s4282_s24 = sld [smem:[#allocation23_spill]]  ;;  %s4284_s1 = smov %s3392_s22 }
0x196a   : > { %s4283_s0 = sld [smem:[#allocation25_spill]]  ;;  %s4285_s22 = smov %s3396_s23 }
0x196f   : > { %p40_p6 = scmp.ge.s32.totalorder %s4282_s24, 4  }
0x1970   : > { %s4286_s23 = smov %s4283_s0 }
0x1971   :  { %42 = sbr.rel (!%p40_p6) target bundleno = 27 (0x1b), region = 194 }
0x1976   :  { %2517 = vsyncpa [#allocation3], 1 }
0x1977   :  { %2519 = vsyncpa [#allocation3 + $0x1], 1 }
0x1978   :  { %2520 = vsyncpa [#allocation6], 1 }
0x1979   :  { %2522 = vsyncpa [#allocation6 + $0x1], 1 }
0x197a   :  { %2523 = vsyncpa [#allocation9], 1 }
0x197b   :  { %2525 = vsyncpa [#allocation9 + $0x1], 1 }
0x197c   :  { %2526 = vsyncpa [#allocation12], 1 }
0x197d   :  { %2527 = vsyncpa [#allocation4], 1 }
0x197e   :  { %2529 = vsyncpa [#allocation4 + $0x1], 1 }

</bundles_post_ra>
